<compile_context>
chip_gen: v6e
topology: v6e:2x2x1
jax: 0.10.0
libtpu: 0.0.40
codegen_flags: <defaults>
</compile_context>

<pallas_src>
import functools
import math

import jax
import jax.numpy as jnp
from jax import lax
from jax.experimental import pallas as pl
from jax.experimental.pallas import tpu as pltpu


def _round_up(n, m):
    return (n + m - 1) // m * m


def _vmem_capacity_bytes():
    try:
        return int(pltpu.get_tpu_info().vmem_capacity_bytes)
    except Exception:
        return 64 << 20  # conservative per-core default (v7x)


def _vmem_limit(need_bytes, cap_bytes):
    # Request what we need plus slack, capped at ~65% of physical VMEM so the
    # compiler keeps headroom for its internal scratch (v7x has only 64 MiB/TC).
    ceiling = int(0.65 * cap_bytes)
    return int(min(max(need_bytes + (4 << 20), 16 << 20), ceiling))


# ---------------------------------------------------------------------------
# Phase 1: q/k/v projections (weights resident, softmax scale folded into q)
# ---------------------------------------------------------------------------
def _qkv_proj_kernel(x_ref, wq_ref, wk_ref, wv_ref, q_ref, k_ref, v_ref, *, scale):
    x = x_ref[...]
    q = jnp.dot(x, wq_ref[...], preferred_element_type=jnp.float32)
    q_ref[...] = (q * scale).astype(q_ref.dtype)  # fold 1/sqrt(d_k) into q
    k_ref[...] = jnp.dot(x, wk_ref[...],
                         preferred_element_type=jnp.float32).astype(k_ref.dtype)
    v_ref[...] = jnp.dot(x, wv_ref[...],
                         preferred_element_type=jnp.float32).astype(v_ref.dtype)


# ---------------------------------------------------------------------------
# Phase 2 fast path: k/v VMEM-resident, in-kernel online softmax over kv chunks
# ---------------------------------------------------------------------------
def _attn_resident_kernel(q_ref, k_ref, v_ref, o_ref, *, seq_len, tk, n_full, n_kv):
    tq, d = q_ref.shape
    q = q_ref[...]

    def step(start, m, l, acc, mask_pad):
        k = k_ref[pl.ds(start, tk), :]
        v = v_ref[pl.ds(start, tk), :]
        # Contract last dims directly so k is never transposed (no XLU vxpose).
        s = lax.dot_general(q, k, (((1,), (1,)), ((), ())),
                            preferred_element_type=jnp.float32)
        if mask_pad:  # static: only the tail chunk contains padded keys
            key_idx = start + lax.broadcasted_iota(jnp.int32, s.shape, 1)
            s = jnp.where(key_idx < seq_len, s, -1e30)
        m_new = jnp.maximum(m, s.max(axis=-1, keepdims=True))
        alpha = jnp.exp(m - m_new)
        p = jnp.exp(s - m_new)
        l_new = alpha * l + p.sum(axis=-1, keepdims=True)
        acc_new = alpha * acc + jnp.dot(p.astype(v.dtype), v,
                                        preferred_element_type=jnp.float32)
        return m_new, l_new, acc_new

    m = jnp.full((tq, 1), -jnp.inf, dtype=jnp.float32)
    l = jnp.zeros((tq, 1), dtype=jnp.float32)
    acc = jnp.zeros((tq, d), dtype=jnp.float32)

    if n_full > 0:
        def body(i, carry):
            mm, ll, aa = carry
            start = pl.multiple_of(i * tk, tk)
            return step(start, mm, ll, aa, mask_pad=False)
        m, l, acc = lax.fori_loop(0, n_full, body, (m, l, acc))

    if n_full < n_kv:  # single tail chunk (padding < tk by construction)
        m, l, acc = step(n_full * tk, m, l, acc, mask_pad=True)

    inv = pl.reciprocal(l, approx=True)   # EUP seed, nearly free
    inv = inv * (2.0 - l * inv)           # one Newton step -> ~f32 accurate
    o_ref[...] = (acc * inv).astype(o_ref.dtype)


# ---------------------------------------------------------------------------
# Phase 2 fallback: streaming flash attention (k/v too large for VMEM residency)
# ---------------------------------------------------------------------------
def _attn_stream_kernel(q_ref, k_ref, v_ref, o_ref, m_sc, l_sc, acc_sc,
                        *, seq_len, has_pad):
    ki = pl.program_id(1)
    n_kv = pl.num_programs(1)

    @pl.when(ki == 0)
    def _init():
        m_sc[...] = jnp.full(m_sc.shape, -jnp.inf, dtype=m_sc.dtype)
        l_sc[...] = jnp.zeros(l_sc.shape, dtype=l_sc.dtype)
        acc_sc[...] = jnp.zeros(acc_sc.shape, dtype=acc_sc.dtype)

    s = lax.dot_general(q_ref[...], k_ref[...], (((1,), (1,)), ((), ())),
                        preferred_element_type=jnp.float32)
    if has_pad:
        # Streaming path only triggers for very long sequences where the per-step
        # matmuls dominate; keep the mask unconditional for lowering simplicity.
        tk = s.shape[1]
        key_idx = ki * tk + lax.broadcasted_iota(jnp.int32, s.shape, 1)
        s = jnp.where(key_idx < seq_len, s, -1e30)

    m_prev = m_sc[...]
    m_new = jnp.maximum(m_prev, s.max(axis=-1, keepdims=True))
    alpha = jnp.exp(m_prev - m_new)
    p = jnp.exp(s - m_new)
    l_sc[...] = alpha * l_sc[...] + p.sum(axis=-1, keepdims=True)
    acc_sc[...] = alpha * acc_sc[...] + jnp.dot(
        p.astype(v_ref.dtype), v_ref[...], preferred_element_type=jnp.float32)
    m_sc[...] = m_new

    @pl.when(ki == n_kv - 1)
    def _finalize():
        l = l_sc[...]
        inv = pl.reciprocal(l, approx=True)
        inv = inv * (2.0 - l * inv)
        o_ref[...] = (acc_sc[...] * inv).astype(o_ref.dtype)


# ---------------------------------------------------------------------------
# Wrapper
# ---------------------------------------------------------------------------
def self_attention_v2(x, w_query, w_key, w_value):
    """x: (seq, d_in); w_*: (d_in, d_out). Returns (seq, d_out) in x.dtype."""
    seq, d_in = x.shape
    d_out = w_query.shape[1]
    out_dtype = x.dtype
    itemsize = jnp.dtype(out_dtype).itemsize

    # Tile selection: lane-dense d_out; 256-wide q tile feeds the full v6e/v7x MXU
    # and keeps n_q >= 2 for megacore whenever seq > 256; tk=512 amortizes the
    # ~0.35us per-grid-step overhead.  tq always divides tk, so padding < tk and
    # only the final kv chunk can contain padded keys.
    if seq <= 128:
        tq = tk = 128
    elif seq <= 256:
        tq = tk = 256
    else:
        tq, tk = 256, 512
    seq_p = _round_up(seq, tk)
    din_p = _round_up(d_in, 128)
    dout_p = _round_up(d_out, 128)

    # TODO(synk): for repeated calls, pre-pad the weights once at init time.
    xp = jnp.pad(x, ((0, seq_p - seq), (0, din_p - d_in)))
    pad_w = lambda w: jnp.pad(w, ((0, din_p - d_in), (0, dout_p - d_out)))
    wq_p, wk_p, wv_p = pad_w(w_query), pad_w(w_key), pad_w(w_value)

    scale = 1.0 / math.sqrt(d_out)  # true d_k, not the padded one
    cap = _vmem_capacity_bytes()

    # --- Phase 1: projections -------------------------------------------------
    n_proj = seq_p // tq
    proj_need = itemsize * (2 * tq * din_p + 6 * din_p * dout_p + 6 * tq * dout_p)

    q, k, v = pl.pallas_call(
        functools.partial(_qkv_proj_kernel, scale=scale),
        out_shape=tuple(
            jax.ShapeDtypeStruct((seq_p, dout_p), out_dtype) for _ in range(3)),
        grid_spec=pltpu.PrefetchScalarGridSpec(
            num_scalar_prefetch=0,
            grid=(n_proj,),
            in_specs=[
                pl.BlockSpec((tq, din_p), lambda i: (i, 0)),
                pl.BlockSpec((din_p, dout_p), lambda i: (0, 0)),  # resident
                pl.BlockSpec((din_p, dout_p), lambda i: (0, 0)),  # resident
                pl.BlockSpec((din_p, dout_p), lambda i: (0, 0)),  # resident
            ],
            out_specs=[pl.BlockSpec((tq, dout_p), lambda i: (i, 0))] * 3,
        ),
        compiler_params=pltpu.CompilerParams(
            dimension_semantics=("parallel",),
            vmem_limit_bytes=_vmem_limit(proj_need, cap),
        ),
        cost_estimate=pl.CostEstimate(
            flops=6 * seq_p * din_p * dout_p,
            transcendentals=0,
            bytes_accessed=itemsize * (seq_p * din_p + 3 * din_p * dout_p
                                       + 3 * seq_p * dout_p),
        ),
    )(xp, wq_p, wk_p, wv_p)

    # --- Phase 2: attention ----------------------------------------------------
    n_q = seq_p // tq
    n_kv = seq_p // tk
    n_full = seq // tk  # kv chunks containing only real keys

    # Resident k/v cost (double-buffered constant blocks) + in-kernel f32 values.
    resident_need = (itemsize * (4 * seq_p * dout_p + 4 * tq * dout_p)
                     + 4 * (tq * tk + tq * dout_p + 2 * tq))
    use_resident = resident_need + (4 << 20) <= int(0.65 * cap)

    if use_resident:
        attn = pl.pallas_call(
            functools.partial(_attn_resident_kernel, seq_len=seq, tk=tk,
                              n_full=n_full, n_kv=n_kv),
            out_shape=jax.ShapeDtypeStruct((seq_p, dout_p), out_dtype),
            grid_spec=pltpu.PrefetchScalarGridSpec(
                num_scalar_prefetch=0,
                grid=(n_q,),
                in_specs=[
                    pl.BlockSpec((tq, dout_p), lambda qi: (qi, 0)),
                    pl.BlockSpec((seq_p, dout_p), lambda qi: (0, 0)),  # k resident
                    pl.BlockSpec((seq_p, dout_p), lambda qi: (0, 0)),  # v resident
                ],
                out_specs=pl.BlockSpec((tq, dout_p), lambda qi: (qi, 0)),
            ),
            compiler_params=pltpu.CompilerParams(
                dimension_semantics=("parallel",),
                vmem_limit_bytes=_vmem_limit(resident_need, cap),
            ),
            cost_estimate=pl.CostEstimate(
                flops=4 * seq_p * seq_p * dout_p,
                transcendentals=seq_p * seq_p,
                bytes_accessed=itemsize * 4 * seq_p * dout_p,  # q,k,v read once + out
            ),
        )(q, k, v)
    else:
        stream_need = (itemsize * (2 * tq * dout_p + 4 * tk * dout_p + 2 * tq * dout_p)
                       + 4 * (tq * dout_p + 2 * tq + tq * tk))
        attn = pl.pallas_call(
            functools.partial(_attn_stream_kernel, seq_len=seq,
                              has_pad=(seq_p != seq)),
            out_shape=jax.ShapeDtypeStruct((seq_p, dout_p), out_dtype),
            grid_spec=pltpu.PrefetchScalarGridSpec(
                num_scalar_prefetch=0,
                grid=(n_q, n_kv),
                in_specs=[
                    pl.BlockSpec((tq, dout_p), lambda qi, ki: (qi, 0)),
                    pl.BlockSpec((tk, dout_p), lambda qi, ki: (ki, 0)),
                    pl.BlockSpec((tk, dout_p), lambda qi, ki: (ki, 0)),
                ],
                out_specs=pl.BlockSpec((tq, dout_p), lambda qi, ki: (qi, 0)),
                scratch_shapes=[
                    pltpu.VMEM((tq, 1), jnp.float32),       # running max m
                    pltpu.VMEM((tq, 1), jnp.float32),       # running denom l
                    pltpu.VMEM((tq, dout_p), jnp.float32),  # acc
                ],
            ),
            compiler_params=pltpu.CompilerParams(
                dimension_semantics=("parallel", "arbitrary"),
                vmem_limit_bytes=_vmem_limit(stream_need, cap),
            ),
            cost_estimate=pl.CostEstimate(
                flops=4 * seq_p * seq_p * dout_p,
                transcendentals=seq_p * seq_p,
                # k/v are re-streamed once per q tile in this path.
                bytes_accessed=itemsize * seq_p * dout_p * (2 + 2 * n_q),
            ),
        )(q, k, v)

    return attn[:seq, :d_out]


# ---------------------------------------------------------------------------
# Pure-JAX reference (matches the PyTorch forward pass)
# ---------------------------------------------------------------------------
def reference(x, wq, wk, wv):
    q = x @ wq
    k = x @ wk
    v = x @ wv
    scores = q @ k.T
    weights = jax.nn.softmax(scores / math.sqrt(k.shape[-1]), axis=-1)
    return weights @ v


if __name__ == "__main__":
    attn_fn = jax.jit(self_attention_v2)

    # --- test 1: the exact toy shapes from the module usage (seq=6, d_in=3, d_out=2)
    x = jnp.array(
        [[0.43, 0.15, 0.89],
         [0.55, 0.87, 0.66],
         [0.57, 0.85, 0.64],
         [0.22, 0.58, 0.33],
         [0.77, 0.25, 0.10],
         [0.05, 0.80, 0.55]], dtype=jnp.float32)
    d_in, d_out = 3, 2

    key = jax.random.PRNGKey(0)
    kq, kk, kv, k2x, k2q, k2k, k2v = jax.random.split(key, 7)

    # nn.Linear-style init U(-1/sqrt(d_in), 1/sqrt(d_in)), stored as (d_in, d_out).
    bound = 1.0 / math.sqrt(d_in)
    w_query = jax.random.uniform(kq, (d_in, d_out), jnp.float32, -bound, bound)
    w_key = jax.random.uniform(kk, (d_in, d_out), jnp.float32, -bound, bound)
    w_value = jax.random.uniform(kv, (d_in, d_out), jnp.float32, -bound, bound)

    out = jax.block_until_ready(attn_fn(x, w_query, w_key, w_value))
    ref = reference(x, w_query, w_key, w_value)
    assert out.shape == (6, d_out)
    assert jnp.allclose(out, ref, atol=2e-4, rtol=2e-4), (out, ref)

    # --- test 2: multi-tile resident path (fori_loop over full kv chunks +
    # masked tail chunk + 4 parallel q tiles: seq=600 pads to 1024 with tq=256/tk=512)
    seq2, din2, dout2 = 600, 8, 64
    x2 = jax.random.uniform(k2x, (seq2, din2), dtype=jnp.float32)
    b2 = 1.0 / math.sqrt(din2)
    wq2 = jax.random.uniform(k2q, (din2, dout2), jnp.float32, -b2, b2)
    wk2 = jax.random.uniform(k2k, (din2, dout2), jnp.float32, -b2, b2)
    wv2 = jax.random.uniform(k2v, (din2, dout2), jnp.float32, -b2, b2)

    out2 = jax.block_until_ready(attn_fn(x2, wq2, wk2, wv2))
    ref2 = reference(x2, wq2, wk2, wv2)
    assert out2.shape == (seq2, dout2)
    assert jnp.allclose(out2, ref2, atol=2e-4, rtol=2e-4)

    print("KERNEL_OK")
</pallas_src>

<mosaic_0001>
module attributes {stable_mosaic.version = 11 : i64} {
  func.func @_qkv_proj_kernel(%arg0: i32, %arg1: memref<128x128xf32, #tpu.memory_space<vmem>>, %arg2: memref<128x128xf32, #tpu.memory_space<vmem>>, %arg3: memref<128x128xf32, #tpu.memory_space<vmem>>, %arg4: memref<128x128xf32, #tpu.memory_space<vmem>>, %arg5: memref<128x128xf32, #tpu.memory_space<vmem>>, %arg6: memref<128x128xf32, #tpu.memory_space<vmem>>, %arg7: memref<128x128xf32, #tpu.memory_space<vmem>>) attributes {dimension_semantics = [#tpu.dimension_semantics<parallel>], iteration_bounds = array<i64: 1>, scalar_prefetch = 0 : i64, scratch_operands = 0 : i64, tpu.core_type = #tpu.core_type<tc>, window_params = [{transform_indices = @transform_0, window_bounds = array<i64: 128, 128>}, {pipeline_mode = #tpu.pipeline_mode<synchronous>, transform_indices = @transform_1, window_bounds = array<i64: 128, 128>}, {pipeline_mode = #tpu.pipeline_mode<synchronous>, transform_indices = @transform_2, window_bounds = array<i64: 128, 128>}, {pipeline_mode = #tpu.pipeline_mode<synchronous>, transform_indices = @transform_3, window_bounds = array<i64: 128, 128>}, {transform_indices = @transform_4, window_bounds = array<i64: 128, 128>}, {transform_indices = @transform_5, window_bounds = array<i64: 128, 128>}, {transform_indices = @transform_6, window_bounds = array<i64: 128, 128>}]} {
    %c0 = arith.constant 0 : index
    %c0_0 = arith.constant 0 : index
    %0 = vector.load %arg1[%c0, %c0_0] : memref<128x128xf32, #tpu.memory_space<vmem>>, vector<128x128xf32>
    %c0_1 = arith.constant 0 : index
    %c0_2 = arith.constant 0 : index
    %1 = vector.load %arg2[%c0_1, %c0_2] : memref<128x128xf32, #tpu.memory_space<vmem>>, vector<128x128xf32>
    %cst = arith.constant dense<0.000000e+00> : vector<128x128xf32>
    %2 = tpu.matmul %0, %1, %cst {dimension_numbers = #tpu.dot_dimension_numbers<[1], [0], [0], [1], [0, 0, 1, 1], [], []>} : vector<128x128xf32>, vector<128x128xf32>, vector<128x128xf32> -> vector<128x128xf32>
    %cst_3 = arith.constant 0.707106769 : f32
    %3 = vector.broadcast %cst_3 : f32 to vector<128x128xf32>
    %4 = arith.mulf %2, %3 : vector<128x128xf32>
    %c0_4 = arith.constant 0 : index
    %c0_5 = arith.constant 0 : index
    %5 = vector.load %arg5[%c0_4, %c0_5] : memref<128x128xf32, #tpu.memory_space<vmem>>, vector<128x128xf32>
    tpu.vector_store %arg5[%c0_4, %c0_5], %4 {strides = array<i32>} : memref<128x128xf32, #tpu.memory_space<vmem>>, vector<128x128xf32>,
    %c0_6 = arith.constant 0 : index
    %c0_7 = arith.constant 0 : index
    %6 = vector.load %arg3[%c0_6, %c0_7] : memref<128x128xf32, #tpu.memory_space<vmem>>, vector<128x128xf32>
    %cst_8 = arith.constant dense<0.000000e+00> : vector<128x128xf32>
    %7 = tpu.matmul %0, %6, %cst_8 {dimension_numbers = #tpu.dot_dimension_numbers<[1], [0], [0], [1], [0, 0, 1, 1], [], []>} : vector<128x128xf32>, vector<128x128xf32>, vector<128x128xf32> -> vector<128x128xf32>
    %c0_9 = arith.constant 0 : index
    %c0_10 = arith.constant 0 : index
    %8 = vector.load %arg6[%c0_9, %c0_10] : memref<128x128xf32, #tpu.memory_space<vmem>>, vector<128x128xf32>
    tpu.vector_store %arg6[%c0_9, %c0_10], %7 {strides = array<i32>} : memref<128x128xf32, #tpu.memory_space<vmem>>, vector<128x128xf32>,
    %c0_11 = arith.constant 0 : index
    %c0_12 = arith.constant 0 : index
    %9 = vector.load %arg4[%c0_11, %c0_12] : memref<128x128xf32, #tpu.memory_space<vmem>>, vector<128x128xf32>
    %cst_13 = arith.constant dense<0.000000e+00> : vector<128x128xf32>
    %10 = tpu.matmul %0, %9, %cst_13 {dimension_numbers = #tpu.dot_dimension_numbers<[1], [0], [0], [1], [0, 0, 1, 1], [], []>} : vector<128x128xf32>, vector<128x128xf32>, vector<128x128xf32> -> vector<128x128xf32>
    %c0_14 = arith.constant 0 : index
    %c0_15 = arith.constant 0 : index
    %11 = vector.load %arg7[%c0_14, %c0_15] : memref<128x128xf32, #tpu.memory_space<vmem>>, vector<128x128xf32>
    tpu.vector_store %arg7[%c0_14, %c0_15], %10 {strides = array<i32>} : memref<128x128xf32, #tpu.memory_space<vmem>>, vector<128x128xf32>,
    return
  }
  func.func @transform_0(%arg0: i32) -> (i32, i32) {
    %c0_i32 = arith.constant 0 : i32
    %c0_i32_0 = arith.constant 0 : i32
    return %arg0, %c0_i32 : i32, i32
  }
  func.func @transform_1(%arg0: i32) -> (i32, i32) {
    %c0_i32 = arith.constant 0 : i32
    %c0_i32_0 = arith.constant 0 : i32
    %c0_i32_1 = arith.constant 0 : i32
    return %c0_i32, %c0_i32_0 : i32, i32
  }
  func.func @transform_2(%arg0: i32) -> (i32, i32) {
    %c0_i32 = arith.constant 0 : i32
    %c0_i32_0 = arith.constant 0 : i32
    %c0_i32_1 = arith.constant 0 : i32
    return %c0_i32, %c0_i32_0 : i32, i32
  }
  func.func @transform_3(%arg0: i32) -> (i32, i32) {
    %c0_i32 = arith.constant 0 : i32
    %c0_i32_0 = arith.constant 0 : i32
    %c0_i32_1 = arith.constant 0 : i32
    return %c0_i32, %c0_i32_0 : i32, i32
  }
  func.func @transform_4(%arg0: i32) -> (i32, i32) {
    %c0_i32 = arith.constant 0 : i32
    %c0_i32_0 = arith.constant 0 : i32
    return %arg0, %c0_i32 : i32, i32
  }
  func.func @transform_5(%arg0: i32) -> (i32, i32) {
    %c0_i32 = arith.constant 0 : i32
    %c0_i32_0 = arith.constant 0 : i32
    return %arg0, %c0_i32 : i32, i32
  }
  func.func @transform_6(%arg0: i32) -> (i32, i32) {
    %c0_i32 = arith.constant 0 : i32
    %c0_i32_0 = arith.constant 0 : i32
    return %arg0, %c0_i32 : i32, i32
  }
}

module attributes {stable_mosaic.version = 11 : i64} {
  func.func @_attn_resident_kernel(%arg0: i32, %arg1: memref<128x128xf32, #tpu.memory_space<vmem>>, %arg2: memref<128x128xf32, #tpu.memory_space<vmem>>, %arg3: memref<128x128xf32, #tpu.memory_space<vmem>>, %arg4: memref<128x128xf32, #tpu.memory_space<vmem>>) attributes {dimension_semantics = [#tpu.dimension_semantics<parallel>], iteration_bounds = array<i64: 1>, scalar_prefetch = 0 : i64, scratch_operands = 0 : i64, tpu.core_type = #tpu.core_type<tc>, window_params = [{transform_indices = @transform_0, window_bounds = array<i64: 128, 128>}, {pipeline_mode = #tpu.pipeline_mode<synchronous>, transform_indices = @transform_1, window_bounds = array<i64: 128, 128>}, {pipeline_mode = #tpu.pipeline_mode<synchronous>, transform_indices = @transform_2, window_bounds = array<i64: 128, 128>}, {transform_indices = @transform_3, window_bounds = array<i64: 128, 128>}]} {
    %c0 = arith.constant 0 : index
    %c0_0 = arith.constant 0 : index
    %0 = vector.load %arg1[%c0, %c0_0] : memref<128x128xf32, #tpu.memory_space<vmem>>, vector<128x128xf32>
    %cst = arith.constant 0xFF800000 : f32
    %1 = vector.broadcast %cst : f32 to vector<128x1xf32>
    %cst_1 = arith.constant 0.000000e+00 : f32
    %2 = vector.broadcast %cst_1 : f32 to vector<128x1xf32>
    %cst_2 = arith.constant 0.000000e+00 : f32
    %3 = vector.broadcast %cst_2 : f32 to vector<128x128xf32>
    %c0_3 = arith.constant 0 : index
    %c0_4 = arith.constant 0 : index
    %4 = vector.load %arg2[%c0_3, %c0_4] : memref<128x128xf32, #tpu.memory_space<vmem>>, vector<128x128xf32>
    %c0_5 = arith.constant 0 : index
    %c0_6 = arith.constant 0 : index
    %5 = vector.load %arg3[%c0_5, %c0_6] : memref<128x128xf32, #tpu.memory_space<vmem>>, vector<128x128xf32>
    %cst_7 = arith.constant dense<0.000000e+00> : vector<128x128xf32>
    %6 = tpu.matmul %0, %4, %cst_7 {dimension_numbers = #tpu.dot_dimension_numbers<[1], [1], [0], [0], [0, 0, 1, 0], [], []>} : vector<128x128xf32>, vector<128x128xf32>, vector<128x128xf32> -> vector<128x128xf32>
    %7 = tpu.iota {dimensions = array<i32: 1>} : vector<128x128xi32>
    %c0_i32 = arith.constant 0 : i32
    %8 = vector.broadcast %c0_i32 : i32 to vector<128x128xi32>
    %9 = arith.addi %8, %7 : vector<128x128xi32>
    %c6_i32 = arith.constant 6 : i32
    %10 = vector.broadcast %c6_i32 : i32 to vector<128x128xi32>
    %11 = arith.cmpi slt, %9, %10 : vector<128x128xi32>
    %cst_8 = arith.constant -1.000000e+30 : f32
    %12 = vector.broadcast %cst_8 : f32 to vector<128x128xf32>
    %13 = arith.select %11, %6, %12 : vector<128x128xi1>, vector<128x128xf32>
    %cst_9 = arith.constant dense<0xFF800000> : vector<128xf32>
    %14 = vector.multi_reduction <maximumf>, %13, %cst_9 [1] : vector<128x128xf32> to vector<128xf32>
    %15 = vector.shape_cast %14 : vector<128xf32> to vector<128x1xf32>
    %16 = arith.maximumf %1, %15 : vector<128x1xf32>
    %17 = arith.subf %1, %16 : vector<128x1xf32>
    %18 = math.exp %17 : vector<128x1xf32>
    %19 = vector.broadcast %16 : vector<128x1xf32> to vector<128x128xf32>
    %20 = arith.subf %13, %19 : vector<128x128xf32>
    %21 = math.exp %20 : vector<128x128xf32>
    %22 = arith.mulf %18, %2 : vector<128x1xf32>
    %cst_10 = arith.constant dense<0.000000e+00> : vector<128xf32>
    %23 = vector.multi_reduction <add>, %21, %cst_10 [1] : vector<128x128xf32> to vector<128xf32>
    %24 = vector.shape_cast %23 : vector<128xf32> to vector<128x1xf32>
    %25 = arith.addf %22, %24 : vector<128x1xf32>
    %26 = vector.broadcast %18 : vector<128x1xf32> to vector<128x128xf32>
    %27 = arith.mulf %26, %3 : vector<128x128xf32>
    %cst_11 = arith.constant dense<0.000000e+00> : vector<128x128xf32>
    %28 = tpu.matmul %21, %5, %cst_11 {dimension_numbers = #tpu.dot_dimension_numbers<[1], [0], [0], [1], [0, 0, 1, 1], [], []>} : vector<128x128xf32>, vector<128x128xf32>, vector<128x128xf32> -> vector<128x128xf32>
    %29 = arith.addf %27, %28 : vector<128x128xf32>
    %30 = tpu.reciprocal %25 {approx = true} : vector<128x1xf32> -> vector<128x1xf32>
    %31 = arith.mulf %25, %30 : vector<128x1xf32>
    %cst_12 = arith.constant 2.000000e+00 : f32
    %32 = vector.broadcast %cst_12 : f32 to vector<128x1xf32>
    %33 = arith.subf %32, %31 : vector<128x1xf32>
    %34 = arith.mulf %30, %33 : vector<128x1xf32>
    %35 = vector.broadcast %34 : vector<128x1xf32> to vector<128x128xf32>
    %36 = arith.mulf %29, %35 : vector<128x128xf32>
    %c0_13 = arith.constant 0 : index
    %c0_14 = arith.constant 0 : index
    %37 = vector.load %arg4[%c0_13, %c0_14] : memref<128x128xf32, #tpu.memory_space<vmem>>, vector<128x128xf32>
    tpu.vector_store %arg4[%c0_13, %c0_14], %36 {strides = array<i32>} : memref<128x128xf32, #tpu.memory_space<vmem>>, vector<128x128xf32>,
    return
  }
  func.func @transform_0(%arg0: i32) -> (i32, i32) {
    %c0_i32 = arith.constant 0 : i32
    %c0_i32_0 = arith.constant 0 : i32
    return %arg0, %c0_i32 : i32, i32
  }
  func.func @transform_1(%arg0: i32) -> (i32, i32) {
    %c0_i32 = arith.constant 0 : i32
    %c0_i32_0 = arith.constant 0 : i32
    %c0_i32_1 = arith.constant 0 : i32
    return %c0_i32, %c0_i32_0 : i32, i32
  }
  func.func @transform_2(%arg0: i32) -> (i32, i32) {
    %c0_i32 = arith.constant 0 : i32
    %c0_i32_0 = arith.constant 0 : i32
    %c0_i32_1 = arith.constant 0 : i32
    return %c0_i32, %c0_i32_0 : i32, i32
  }
  func.func @transform_3(%arg0: i32) -> (i32, i32) {
    %c0_i32 = arith.constant 0 : i32
    %c0_i32_0 = arith.constant 0 : i32
    return %arg0, %c0_i32 : i32, i32
  }
}

</mosaic_0001>

<bundles_post_ra>
// kernel: self_attention_v2.3
= control target key start
LH: loop header
LB: loop body
LE: loop exit
PB: predicated region body
PF: predicated region fallthrough
CT: control target
= control target key end

     0   :  { %v207_v37 = vlaneseq  ;;  %s1434_s1 = inlined_call_operand.vmem [shape: f32[128,128], index: 1, kind: input, shape index: {}]   ;;  %s1435_s0 = inlined_call_operand.vmem [shape: f32[128,128], index: 0, kind: input, shape index: {}]   ;;  %s1436_s2 = inlined_call_operand.vmem [shape: f32[128,128], index: 2, kind: input, shape index: {}]   ;;  %s1437_s3 = inlined_call_operand.vmem [shape: f32[128,128], index: 3, kind: output, shape index: {}]  }
   0x1   :  { %v45_v0 = vld [vmem:[%s1434_s1 + $0x78] sm:$0xff]  ;;  %v44_v1 = vld [vmem:[%s1434_s1 + $0x70] sm:$0xff]  ;;  %v43_v2 = vld [vmem:[%s1434_s1 + $0x68] sm:$0xff] }
   0x2   :  { %743 = vmatprep.subr.mxu0 %v45_v0  ;;  %v14_v3 = vld [vmem:[%s1435_s0] sm:$0xff]  ;;  %v41_v5 = vld [vmem:[%s1434_s1 + $0x58] sm:$0xff]  ;;  %v40_v6 = vld [vmem:[%s1434_s1 + $0x50] sm:$0xff]  ;;  %v1082_v38 = vand.u32 127, %v207_v37 }
   0x3   :  { %744 = vmatpush3.xpose.msra.mxu0 %v45_v0  ;;  %775 = vmatprep.mubr.f32.mxu0 %v14_v3  ;;  %v42_v4 = vld [vmem:[%s1434_s1 + $0x60] sm:$0xff]  ;;  %v39_v7 = vld [vmem:[%s1434_s1 + $0x48] sm:$0xff]  ;;  %v37_v9 = vld [vmem:[%s1434_s1 + $0x38] sm:$0xff] }
   0x4   :  { %745 = vmatprep.subr.mxu0 %v44_v1  ;;  %v38_v8 = vld [vmem:[%s1434_s1 + $0x40] sm:$0xff]  ;;  %v36_v10 = vld [vmem:[%s1434_s1 + $0x30] sm:$0xff]  ;;  %v35_v11 = vld [vmem:[%s1434_s1 + $0x28] sm:$0xff]  ;;  %vm209_vm0 = vcmp.lt.s32.totalorder %v1082_v38, 6 }
   0x5   :  { %v34_v12 = vld [vmem:[%s1434_s1 + $0x20] sm:$0xff]  ;;  %v33_v13 = vld [vmem:[%s1434_s1 + $0x18] sm:$0xff]  ;;  %v32_v14 = vld [vmem:[%s1434_s1 + $0x10] sm:$0xff] }
   0x6   :  { %v31_v15 = vld [vmem:[%s1434_s1 + $0x8] sm:$0xff]  ;;  %v30_v16 = vld [vmem:[%s1434_s1] sm:$0xff]  ;;  %v16_v18 = vld [vmem:[%s1435_s0 + $0x10] sm:$0xff] }
   0x7   :  { %746 = vmatpush3.xpose.msra.mxu0 %v44_v1  ;;  %v15_v17 = vld [vmem:[%s1435_s0 + $0x8] sm:$0xff]  ;;  %v17_v19 = vld [vmem:[%s1435_s0 + $0x18] sm:$0xff]  ;;  %v18_v20 = vld [vmem:[%s1435_s0 + $0x20] sm:$0xff] }
   0x8   :  { %747 = vmatprep.subr.mxu0 %v43_v2  ;;  %v19_v21 = vld [vmem:[%s1435_s0 + $0x28] sm:$0xff]  ;;  %v20_v22 = vld [vmem:[%s1435_s0 + $0x30] sm:$0xff]  ;;  %v21_v23 = vld [vmem:[%s1435_s0 + $0x38] sm:$0xff] }
   0x9   :  { %v22_v24 = vld [vmem:[%s1435_s0 + $0x40] sm:$0xff]  ;;  %v23_v25 = vld [vmem:[%s1435_s0 + $0x48] sm:$0xff]  ;;  %v24_v26 = vld [vmem:[%s1435_s0 + $0x50] sm:$0xff] }
   0xa   :  { %v25_v27 = vld [vmem:[%s1435_s0 + $0x58] sm:$0xff]  ;;  %v26_v28 = vld [vmem:[%s1435_s0 + $0x60] sm:$0xff]  ;;  %v27_v29 = vld [vmem:[%s1435_s0 + $0x68] sm:$0xff] }
   0xb   :  { %748 = vmatpush3.xpose.msra.mxu0 %v43_v2  ;;  %v28_v30 = vld [vmem:[%s1435_s0 + $0x70] sm:$0xff]  ;;  %v29_v31 = vld [vmem:[%s1435_s0 + $0x78] sm:$0xff]  ;;  %v59_v34 = vld [vmem:[%s1436_s2 + $0x68] sm:$0xff] }
   0xc   :  { %749 = vmatprep.subr.mxu0 %v42_v4  ;;  %v61_v32 = vld [vmem:[%s1436_s2 + $0x78] sm:$0xff]  ;;  %v60_v33 = vld [vmem:[%s1436_s2 + $0x70] sm:$0xff]  ;;  %v58_v35 = vld [vmem:[%s1436_s2 + $0x60] sm:$0xff] }
   0xd   :  { %799 = vmatprep.subr.mxu1 %v61_v32  ;;  %v57_v36 = vld [vmem:[%s1436_s2 + $0x58] sm:$0xff]  ;;  %v56_v52 = vld [vmem:[%s1436_s2 + $0x50] sm:$0xff]  ;;  %v55_v56 = vld [vmem:[%s1436_s2 + $0x48] sm:$0xff] }
   0xe   :  { %800 = vmatpush3.msra.mxu1 %v61_v32  ;;  %v54_v61 = vld [vmem:[%s1436_s2 + $0x40] sm:$0xff]  ;;  %v53_v63 = vld [vmem:[%s1436_s2 + $0x38] sm:$0xff]  ;;  %v52_v3 = vld [vmem:[%s1436_s2 + $0x30] sm:$0xff] }
   0xf   :  { %750 = vmatpush3.xpose.msra.mxu0 %v42_v4  ;;  %801 = vmatprep.subr.mxu1 %v60_v33 }
  0x10   :  { %751 = vmatprep.subr.mxu0 %v41_v5  ;;  %802 = vmatpush3.msra.mxu1 %v60_v33 }
  0x11   :  { %803 = vmatprep.subr.mxu1 %v59_v34 }
  0x12   :  { %804 = vmatpush3.msra.mxu1 %v59_v34 }
  0x13   :  { %752 = vmatpush3.xpose.msra.mxu0 %v41_v5  ;;  %805 = vmatprep.subr.mxu1 %v58_v35  ;;  %v51_v5 = vld [vmem:[%s1436_s2 + $0x28] sm:$0xff] }
  0x14   :  { %753 = vmatprep.subr.mxu0 %v40_v6  ;;  %806 = vmatpush3.msra.mxu1 %v58_v35 }
  0x15   :  { %807 = vmatprep.subr.mxu1 %v57_v36 }
  0x16   :  { %808 = vmatpush3.msra.mxu1 %v57_v36 }
  0x17   :  { %754 = vmatpush3.xpose.msra.mxu0 %v40_v6  ;;  %809 = vmatprep.subr.mxu1 %v56_v52 }
  0x18   :  { %755 = vmatprep.subr.mxu0 %v39_v7  ;;  %810 = vmatpush3.msra.mxu1 %v56_v52 }
  0x19   :  { %811 = vmatprep.subr.mxu1 %v55_v56 }
  0x1a   :  { %812 = vmatpush3.msra.mxu1 %v55_v56 }
  0x1b   :  { %756 = vmatpush3.xpose.msra.mxu0 %v39_v7  ;;  %813 = vmatprep.subr.mxu1 %v54_v61 }
  0x1c   :  { %757 = vmatprep.subr.mxu0 %v38_v8  ;;  %814 = vmatpush3.msra.mxu1 %v54_v61 }
  0x1d   :  { %815 = vmatprep.subr.mxu1 %v53_v63 }
  0x1e   :  { %816 = vmatpush3.msra.mxu1 %v53_v63 }
  0x1f   :  { %758 = vmatpush3.xpose.msra.mxu0 %v38_v8  ;;  %817 = vmatprep.subr.mxu1 %v52_v3 }
  0x20   :  { %759 = vmatprep.subr.mxu0 %v37_v9  ;;  %818 = vmatpush3.msra.mxu1 %v52_v3 }
  0x21   :  { %819 = vmatprep.subr.mxu1 %v51_v5 }
  0x22   :  { %820 = vmatpush3.msra.mxu1 %v51_v5 }
  0x23   :  { %760 = vmatpush3.xpose.msra.mxu0 %v37_v9  ;;  %v50_v9 = vld [vmem:[%s1436_s2 + $0x20] sm:$0xff] }
  0x24   :  { %761 = vmatprep.subr.mxu0 %v36_v10  ;;  %821 = vmatprep.subr.mxu1 %v50_v9 }
  0x25   :  { %822 = vmatpush3.msra.mxu1 %v50_v9 }
  0x27   :  { %762 = vmatpush3.xpose.msra.mxu0 %v36_v10 }
  0x28   :  { %763 = vmatprep.subr.mxu0 %v35_v11 }
  0x2b   :  { %764 = vmatpush3.xpose.msra.mxu0 %v35_v11 }
  0x2c   :  { %765 = vmatprep.subr.mxu0 %v34_v12 }
  0x2f   :  { %766 = vmatpush3.xpose.msra.mxu0 %v34_v12 }
  0x30   :  { %767 = vmatprep.subr.mxu0 %v33_v13 }
  0x33   :  { %768 = vmatpush3.xpose.msra.mxu0 %v33_v13  ;;  %v49_v13 = vld [vmem:[%s1436_s2 + $0x18] sm:$0xff] }
  0x34   :  { %769 = vmatprep.subr.mxu0 %v32_v14  ;;  %823 = vmatprep.subr.mxu1 %v49_v13 }
  0x35   :  { %824 = vmatpush3.msra.mxu1 %v49_v13 }
  0x37   :  { %770 = vmatpush3.xpose.msra.mxu0 %v32_v14  ;;  %v48_v14 = vld [vmem:[%s1436_s2 + $0x10] sm:$0xff] }
  0x38   :  { %771 = vmatprep.subr.mxu0 %v31_v15  ;;  %825 = vmatprep.subr.mxu1 %v48_v14 }
  0x39   :  { %826 = vmatpush3.msra.mxu1 %v48_v14 }
  0x3b   :  { %772 = vmatpush3.xpose.msra.mxu0 %v31_v15 }
  0x3c   :  { %773 = vmatprep.subr.mxu0 %v30_v16 }
  0x3f   :  { %774 = vmatpush3.xpose.msra.mxu0 %v30_v16  ;;  %v47_v16 = vld [vmem:[%s1436_s2 + $0x8] sm:$0xff] }
  0x40   :  { %827 = vmatprep.subr.mxu1 %v47_v16 }
  0x41   :  { %828 = vmatpush3.msra.mxu1 %v47_v16 }
  0x42   :  { %776 = vmatmul.mubr.f32.vlgmr.msra.gmra.mxu0 %v15_v17  ;;  %v46_v17 = vld [vmem:[%s1436_s2] sm:$0xff] }
  0x43   :  { %778 = vmatprep.mubr.f32.mxu0 %v16_v18  ;;  %829 = vmatprep.subr.mxu1 %v46_v17 }
  0x44   :  { %830 = vmatpush3.msra.mxu1 %v46_v17 }
  0x46   :  { %779 = vmatmul.mubr.f32.gmra.mxu0 %v17_v19 }
  0x47   :  { %781 = vmatprep.mubr.f32.mxu0 %v18_v20 }
  0x4a   :  { %782 = vmatmul.mubr.f32.gmra.mxu0 %v19_v21 }
  0x4b   :  { %784 = vmatprep.mubr.f32.mxu0 %v20_v22 }
  0x4e   :  { %785 = vmatmul.mubr.f32.gmra.mxu0 %v21_v23 }
  0x4f   :  { %787 = vmatprep.mubr.f32.mxu0 %v22_v24 }
  0x52   :  { %788 = vmatmul.mubr.f32.gmra.mxu0 %v23_v25 }
  0x53   :  { %790 = vmatprep.mubr.f32.mxu0 %v24_v26 }
  0x56   :  { %791 = vmatmul.mubr.f32.gmra.mxu0 %v25_v27 }
  0x57   :  { %793 = vmatprep.mubr.f32.mxu0 %v26_v28 }
  0x5a   :  { %794 = vmatmul.mubr.f32.gmra.mxu0 %v27_v29 }
  0x5b   :  { %796 = vmatprep.mubr.f32.mxu0 %v28_v30 }
  0x5e   :  { %797 = vmatmul.mubr.f32.gmra.mxu0 %v29_v31 }
 0x102   :  { %v777_v39 = vpop.f32.mrf.mxu0 }
 0x103   :  { %v1092_v44 = vsel %vm209_vm0, %v777_v39, -1e+30 }
 0x104   :  { %v128_v40 = vpop.f32.mrf.mxu0 }
 0x105   :  { %v1087_v41 = vsel %vm209_vm0, %v128_v40, -1e+30 }
 0x106   :  { %226 = vmax.xlane.f32.xlu0 %v1087_v41  ;;  %v780_v42 = vpop.f32.mrf.mxu0 }
 0x107   :  { %v1102_v48 = vsel %vm209_vm0, %v780_v42, -1e+30 }
 0x108   :  { %v138_v43 = vpop.f32.mrf.mxu0 }
 0x109   :  { %v1096_v45 = vsel %vm209_vm0, %v138_v43, -1e+30 }
 0x10a   :  { %228 = vmax.xlane.f32.xlu0 %v1092_v44  ;;  %230 = vmax.xlane.f32.xlu1 %v1096_v45  ;;  %v783_v46 = vpop.f32.mrf.mxu0 }
 0x10b   :  { %v1115_v53 = vsel %vm209_vm0, %v783_v46, -1e+30 }
 0x10c   :  { %v148_v47 = vpop.f32.mrf.mxu0 }
 0x10d   :  { %v1106_v49 = vsel %vm209_vm0, %v148_v47, -1e+30 }
 0x10e   :  { %232 = vmax.xlane.f32.xlu1 %v1102_v48  ;;  %234 = vmax.xlane.f32.xlu0 %v1106_v49  ;;  %v786_v50 = vpop.f32.mrf.mxu0 }
 0x10f   :  { %v1128_v58 = vsel %vm209_vm0, %v786_v50, -1e+30 }
 0x110   :  { %v158_v51 = vpop.f32.mrf.mxu0 }
 0x111   :  { %v1119_v54 = vsel %vm209_vm0, %v158_v51, -1e+30 }
 0x112   :  { %236 = vmax.xlane.f32.xlu1 %v1115_v53  ;;  %238 = vmax.xlane.f32.xlu0 %v1119_v54  ;;  %v789_v55 = vpop.f32.mrf.mxu0 }
 0x113   :  { %v1144_v0 = vsel %vm209_vm0, %v789_v55, -1e+30 }
 0x114   :  { %v168_v57 = vpop.f32.mrf.mxu0 }
 0x115   :  { %v1132_v59 = vsel %vm209_vm0, %v168_v57, -1e+30 }
 0x116   :  { %240 = vmax.xlane.f32.xlu1 %v1128_v58  ;;  %242 = vmax.xlane.f32.xlu0 %v1132_v59  ;;  %v792_v60 = vpop.f32.mrf.mxu0 }
 0x117   :  { %v1160_v6 = vsel %vm209_vm0, %v792_v60, -1e+30 }
 0x118   :  { %v178_v62 = vpop.f32.mrf.mxu0 }
 0x119   :  { %v1148_v1 = vsel %vm209_vm0, %v178_v62, -1e+30 }
 0x11a   :  { %244 = vmax.xlane.f32.xlu1 %v1144_v0  ;;  %246 = vmax.xlane.f32.xlu0 %v1148_v1  ;;  %v795_v2 = vpop.f32.mrf.mxu0 }
 0x11b   :  { %v1173_v11 = vsel %vm209_vm0, %v795_v2, -1e+30 }
 0x11c   :  { %v188_v4 = vpop.f32.mrf.mxu0 }
 0x11d   :  { %v1164_v7 = vsel %vm209_vm0, %v188_v4, -1e+30 }
 0x11e   :  { %248 = vmax.xlane.f32.xlu1 %v1160_v6  ;;  %250 = vmax.xlane.f32.xlu0 %v1164_v7  ;;  %v798_v8 = vpop.f32.mrf.mxu0 }
 0x11f   :  { %v1189_v15 = vsel %vm209_vm0, %v798_v8, -1e+30 }
 0x120   :  { %v198_v10 = vpop.f32.mrf.mxu0 }
 0x121   :  { %v1177_v12 = vsel %vm209_vm0, %v198_v10, -1e+30 }
 0x122   :  { %252 = vmax.xlane.f32.xlu1 %v1173_v11  ;;  %254 = vmax.xlane.f32.xlu0 %v1177_v12 }
 0x126   :  { %256 = vmax.xlane.f32.xlu1 %v1189_v15 }
 0x18f   :  { %v1198_v18 = vpop.xlane.xlu0 %226 }
 0x190   :  { %v306_v19 = vsub.f32 %v1087_v41, %v1198_v18 }
 0x192   :  { %v322_v20 = vmul.f32 1.442695, %v306_v19 }
 0x193   :  { %v1202_v21 = vpop.xlane.xlu0 %228  ;;  %v1204_v22 = vpop.xlane.xlu1 %230 }
 0x194   :  { %v307_v23 = vsub.f32 %v1092_v44, %v1202_v21  ;;  %855 = vpow2.f32 %v322_v20  ;;  %v308_v24 = vsub.f32 %v1096_v45, %v1204_v22  ;;  %v259_v19 = vsub.f32 -inf, %v1202_v21 }
 0x195   :  { %v258_v20 = vsub.f32 -inf, %v1198_v18 }
 0x196   :  { %v324_v25 = vmul.f32 1.442695, %v307_v23  ;;  %v326_v26 = vmul.f32 1.442695, %v308_v24  ;;  %v276_v24 = vmul.f32 1.442695, %v259_v19 }
 0x197   :  { %v1210_v27 = vpop.xlane.xlu1 %232  ;;  %v1212_v28 = vpop.xlane.xlu0 %234 }
 0x198   :  { %v309_v29 = vsub.f32 %v1102_v48, %v1210_v27  ;;  %857 = vpow2.f32 %v324_v25  ;;  %v310_v30 = vsub.f32 %v1106_v49, %v1212_v28  ;;  %v261_v23 = vsub.f32 -inf, %v1210_v27 }
 0x199   :  { %859 = vpow2.f32 %v326_v26  ;;  %v274_v25 = vmul.f32 1.442695, %v258_v20  ;;  %v260_v26 = vsub.f32 -inf, %v1204_v22 }
 0x19a   :  { %v328_v31 = vmul.f32 1.442695, %v309_v29  ;;  %v330_v32 = vmul.f32 1.442695, %v310_v30  ;;  %v280_v29 = vmul.f32 1.442695, %v261_v23 }
 0x19b   :  { %v1218_v33 = vpop.xlane.xlu1 %236  ;;  %v1220_v34 = vpop.xlane.xlu0 %238 }
 0x19c   :  { %v311_v35 = vsub.f32 %v1115_v53, %v1218_v33  ;;  %861 = vpow2.f32 %v328_v31  ;;  %v312_v36 = vsub.f32 %v1119_v54, %v1220_v34  ;;  %v263_v30 = vsub.f32 -inf, %v1218_v33 }
 0x19d   :  { %863 = vpow2.f32 %v330_v32  ;;  %v278_v31 = vmul.f32 1.442695, %v260_v26  ;;  %v262_v32 = vsub.f32 -inf, %v1212_v28 }
 0x19e   :  { %v332_v37 = vmul.f32 1.442695, %v311_v35  ;;  %v334_v38 = vmul.f32 1.442695, %v312_v36  ;;  %v284_v36 = vmul.f32 1.442695, %v263_v30 }
 0x19f   :  { %v1226_v39 = vpop.xlane.xlu1 %240  ;;  %v1228_v40 = vpop.xlane.xlu0 %242  ;;  %v282_v27 = vmul.f32 1.442695, %v262_v32 }
 0x1a0   :  { %v313_v41 = vsub.f32 %v1128_v58, %v1226_v39  ;;  %865 = vpow2.f32 %v332_v37  ;;  %v314_v42 = vsub.f32 %v1132_v59, %v1228_v40  ;;  %v265_v18 = vsub.f32 -inf, %v1226_v39 }
 0x1a1   :  { %v856_v43 = vpop.eup %855  ;;  %867 = vpow2.f32 %v334_v38  ;;  %v264_v37 = vsub.f32 -inf, %v1220_v34  ;;  %v266_v28 = vsub.f32 -inf, %v1228_v40 }
 0x1a2   :  { %v336_v44 = vmul.f32 1.442695, %v313_v41  ;;  %v338_v45 = vmul.f32 1.442695, %v314_v42  ;;  %831 = vmatprep.mubr.f32.mxu1 %v856_v43  ;;  %370 = vadd.xlane.f32.xlu0 %v856_v43  ;;  %v288_v38 = vmul.f32 1.442695, %v265_v18 }
 0x1a3   :  { %v1234_v46 = vpop.xlane.xlu1 %244  ;;  %v1236_v47 = vpop.xlane.xlu0 %246  ;;  %v286_v42 = vmul.f32 1.442695, %v264_v37 }
 0x1a4   :  { %v315_v48 = vsub.f32 %v1144_v0, %v1234_v46  ;;  %869 = vpow2.f32 %v336_v44  ;;  %v316_v49 = vsub.f32 %v1148_v1, %v1236_v47  ;;  %v267_v33 = vsub.f32 -inf, %v1234_v46 }
 0x1a5   :  { %v858_v50 = vpop.eup %857  ;;  %871 = vpow2.f32 %v338_v45  ;;  %v268_v39 = vsub.f32 -inf, %v1236_v47 }
 0x1a6   :  { %v340_v51 = vmul.f32 1.442695, %v315_v48  ;;  %v342_v52 = vmul.f32 1.442695, %v316_v49  ;;  %832 = vmatmul.mubr.f32.vlgmr.msra.gmra.mxu1 %v858_v50  ;;  %372 = vadd.xlane.f32.xlu1 %v858_v50  ;;  %v860_v55 = vpop.eup %859  ;;  %v292_v44 = vmul.f32 1.442695, %v267_v33 }
 0x1a7   :  { %v1242_v53 = vpop.xlane.xlu1 %248  ;;  %v1244_v54 = vpop.xlane.xlu0 %250  ;;  %374 = vadd.xlane.f32.xlu0 %v860_v55  ;;  %834 = vmatprep.mubr.f32.mxu1 %v860_v55  ;;  %v290_v50 = vmul.f32 1.442695, %v266_v28  ;;  %v294_v55 = vmul.f32 1.442695, %v268_v39 }
 0x1a8   :  { %v317_v56 = vsub.f32 %v1160_v6, %v1242_v53  ;;  %873 = vpow2.f32 %v340_v51  ;;  %v318_v57 = vsub.f32 %v1164_v7, %v1244_v54  ;;  %v269_v43 = vsub.f32 -inf, %v1242_v53 }
 0x1a9   :  { %v862_v58 = vpop.eup %861  ;;  %875 = vpow2.f32 %v342_v52  ;;  %v270_v48 = vsub.f32 -inf, %v1244_v54 }
 0x1aa   :  { %v344_v59 = vmul.f32 1.442695, %v317_v56  ;;  %v346_v60 = vmul.f32 1.442695, %v318_v57  ;;  %835 = vmatmul.mubr.f32.gmra.mxu1 %v862_v58  ;;  %376 = vadd.xlane.f32.xlu1 %v862_v58  ;;  %v864_v63 = vpop.eup %863  ;;  %v296_v51 = vmul.f32 1.442695, %v269_v43 }
 0x1ab   :  { %v1250_v61 = vpop.xlane.xlu1 %252  ;;  %v1252_v62 = vpop.xlane.xlu0 %254  ;;  %378 = vadd.xlane.f32.xlu0 %v864_v63  ;;  %837 = vmatprep.mubr.f32.mxu1 %v864_v63  ;;  %v298_v53 = vmul.f32 1.442695, %v270_v48 }
 0x1ac   :  { %v319_v0 = vsub.f32 %v1173_v11, %v1250_v61  ;;  %877 = vpow2.f32 %v344_v59  ;;  %v320_v1 = vsub.f32 %v1177_v12, %v1252_v62  ;;  %v271_v40 = vsub.f32 -inf, %v1250_v61 }
 0x1ad   :  { %v866_v2 = vpop.eup %865  ;;  %879 = vpow2.f32 %v346_v60  ;;  %v272_v54 = vsub.f32 -inf, %v1252_v62 }
 0x1ae   :  { %v348_v3 = vmul.f32 1.442695, %v319_v0  ;;  %v350_v4 = vmul.f32 1.442695, %v320_v1  ;;  %838 = vmatmul.mubr.f32.gmra.mxu1 %v866_v2  ;;  %380 = vadd.xlane.f32.xlu1 %v866_v2  ;;  %v868_v6 = vpop.eup %867  ;;  %v300_v61 = vmul.f32 1.442695, %v271_v40 }
 0x1af   :  { %v1258_v5 = vpop.xlane.xlu1 %256  ;;  %382 = vadd.xlane.f32.xlu0 %v868_v6  ;;  %840 = vmatprep.mubr.f32.mxu1 %v868_v6  ;;  %v302_v6 = vmul.f32 1.442695, %v272_v54 }
 0x1b0   :  { %v321_v7 = vsub.f32 %v1189_v15, %v1258_v5  ;;  %881 = vpow2.f32 %v348_v3  ;;  %v273_v1 = vsub.f32 -inf, %v1258_v5 }
 0x1b1   :  { %v870_v8 = vpop.eup %869  ;;  %883 = vpow2.f32 %v350_v4 }
 0x1b2   :  { %v352_v9 = vmul.f32 1.442695, %v321_v7  ;;  %841 = vmatmul.mubr.f32.gmra.mxu1 %v870_v8  ;;  %384 = vadd.xlane.f32.xlu1 %v870_v8  ;;  %v872_v10 = vpop.eup %871 }
 0x1b3   :  { %386 = vadd.xlane.f32.xlu0 %v872_v10  ;;  %843 = vmatprep.mubr.f32.mxu1 %v872_v10 }
 0x1b4   :  { %885 = vpow2.f32 %v352_v9  ;;  %v304_v9 = vmul.f32 1.442695, %v273_v1 }
 0x1b5   :  { %v874_v11 = vpop.eup %873  ;;  %887 = vpow2.f32 %v276_v24 }
 0x1b6   :  { %844 = vmatmul.mubr.f32.gmra.mxu1 %v874_v11  ;;  %388 = vadd.xlane.f32.xlu1 %v874_v11  ;;  %v876_v12 = vpop.eup %875  ;;  %889 = vpow2.f32 %v274_v25 }
 0x1b7   :  { %390 = vadd.xlane.f32.xlu0 %v876_v12  ;;  %846 = vmatprep.mubr.f32.mxu1 %v876_v12  ;;  %891 = vpow2.f32 %v280_v29 }
 0x1b8   :  { %893 = vpow2.f32 %v278_v31 }
 0x1b9   :  { %v878_v13 = vpop.eup %877  ;;  %895 = vpow2.f32 %v284_v36 }
 0x1ba   :  { %847 = vmatmul.mubr.f32.gmra.mxu1 %v878_v13  ;;  %392 = vadd.xlane.f32.xlu1 %v878_v13  ;;  %v880_v14 = vpop.eup %879  ;;  %897 = vpow2.f32 %v282_v27 }
 0x1bb   :  { %394 = vadd.xlane.f32.xlu0 %v880_v14  ;;  %849 = vmatprep.mubr.f32.mxu1 %v880_v14  ;;  %899 = vpow2.f32 %v288_v38 }
 0x1bc   :  { %901 = vpow2.f32 %v286_v42 }
 0x1bd   :  { %v882_v15 = vpop.eup %881  ;;  %903 = vpow2.f32 %v292_v44 }
 0x1be   :  { %850 = vmatmul.mubr.f32.gmra.mxu1 %v882_v15  ;;  %396 = vadd.xlane.f32.xlu1 %v882_v15  ;;  %v884_v16 = vpop.eup %883  ;;  %905 = vpow2.f32 %v290_v50 }
 0x1bf   :  { %398 = vadd.xlane.f32.xlu0 %v884_v16  ;;  %852 = vmatprep.mubr.f32.mxu1 %v884_v16  ;;  %907 = vpow2.f32 %v296_v51 }
 0x1c0   :  { %909 = vpow2.f32 %v294_v55 }
 0x1c1   :  { %v886_v17 = vpop.eup %885  ;;  %911 = vpow2.f32 %v298_v53 }
 0x1c2   :  { %400 = vadd.xlane.f32.xlu1 %v886_v17  ;;  %853 = vmatmul.mubr.f32.gmra.mxu1 %v886_v17  ;;  %v888_v45 = vpop.eup %887 }
 0x1c3   :  { %v890_v49 = vpop.eup %889  ;;  %v1276_v56 = vmul.f32 0.0, %v888_v45 }
 0x1c4   :  { %v892_v52 = vpop.eup %891  ;;  %v1278_v57 = vmul.f32 0.0, %v890_v49 }
 0x1c5   :  { %v894_v47 = vpop.eup %893  ;;  %v1283_v60 = vmul.f32 0.0, %v892_v52 }
 0x1c6   :  { %v896_v0 = vpop.eup %895  ;;  %v1286_v2 = vmul.f32 0.0, %v894_v47 }
 0x1c7   :  { %v898_v62 = vpop.eup %897  ;;  %v1290_v8 = vmul.f32 0.0, %v896_v0 }
 0x1c8   :  { %v900_v10 = vpop.eup %899  ;;  %v1292_v11 = vmul.f32 0.0, %v898_v62 }
 0x1c9   :  { %v902_v13 = vpop.eup %901  ;;  %v1298_v16 = vmul.f32 0.0, %v900_v10 }
 0x1ca   :  { %v904_v17 = vpop.eup %903  ;;  %v1300_v19 = vmul.f32 0.0, %v902_v13 }
 0x1cb   :  { %v906_v23 = vpop.eup %905  ;;  %v1309_v29 = vmul.f32 0.0, %v904_v17 }
 0x1cc   :  { %v908_v25 = vpop.eup %907 }
 0x1cd   :  { %v910_v30 = vpop.eup %909  ;;  %v1317_v18 = vmul.f32 0.0, %v908_v25 }
 0x1ce   :  { %v912_v32 = vpop.eup %911  ;;  %v1323_v38 = vmul.f32 0.0, %v910_v30 }
 0x1cf   :  { %v1336_v52 = vmul.f32 0.0, %v912_v32 }
 0x22b   :  { %v371_v21 = vpop.xlane.xlu0 %370 }
 0x22c   :  { %v402_v59 = vadd.f32 %v371_v21, %v1278_v57 }
 0x22f   :  { %v373_v35 = vpop.xlane.xlu1 %372 }
 0x230   :  { %v375_v41 = vpop.xlane.xlu0 %374  ;;  %v403_v58 = vadd.f32 %v373_v35, %v1276_v56  ;;  %v1312_v35 = vmul.f32 0.0, %v906_v23 }
 0x231   :  { %v404_v7 = vadd.f32 %v375_v41, %v1286_v2 }
 0x232   :  { %913 = vrcp.f32 %v403_v58 }
 0x233   :  { %v377_v22 = vpop.xlane.xlu1 %376  ;;  %915 = vrcp.f32 %v402_v59 }
 0x234   :  { %v379_v46 = vpop.xlane.xlu0 %378  ;;  %v405_v3 = vadd.f32 %v377_v22, %v1283_v60  ;;  %917 = vpow2.f32 %v300_v61 }
 0x235   :  { %v1296_v14 = vadd.f32 %v379_v46, %v1292_v11 }
 0x236   :  { %919 = vrcp.f32 %v405_v3 }
 0x237   :  { %v381_v34 = vpop.xlane.xlu1 %380  ;;  %921 = vpow2.f32 %v302_v6 }
 0x238   :  { %v383_v4 = vpop.xlane.xlu0 %382  ;;  %v407_v5 = vadd.f32 %v381_v34, %v1290_v8  ;;  %923 = vrcp.f32 %v404_v7 }
 0x239   :  { %925 = vpow2.f32 %v304_v9  ;;  %v1307_v26 = vadd.f32 %v383_v4, %v1300_v19 }
 0x23a   :  { %927 = vrcp.f32 %v407_v5 }
 0x23b   :  { %v385_v63 = vpop.xlane.xlu1 %384  ;;  %929 = vrcp.f32 %v1296_v14 }
 0x23c   :  { %v387_v15 = vpop.xlane.xlu0 %386  ;;  %v1303_v20 = vadd.f32 %v385_v63, %v1298_v16 }
 0x23d   :  { %v1321_v37 = vadd.f32 %v387_v15, %v1312_v35 }
 0x23e   :  { %931 = vrcp.f32 %v1303_v20 }
 0x23f   :  { %v389_v12 = vpop.xlane.xlu1 %388  ;;  %v914_v21 = vpop.eup %913  ;;  %933 = vrcp.f32 %v1307_v26 }
 0x240   :  { %v391_v31 = vpop.xlane.xlu0 %390  ;;  %v1315_v36 = vadd.f32 %v389_v12, %v1309_v29  ;;  %v916_v27 = vpop.eup %915  ;;  %v596_v28 = vmul.f32 %v914_v21, %v403_v58 }
 0x241   :  { %v918_v22 = vpop.eup %917  ;;  %v595_v44 = vmul.f32 %v916_v27, %v402_v59  ;;  %v1330_v39 = vadd.f32 %v391_v31, %v1323_v38 }
 0x242   :  { %935 = vrcp.f32 %v1315_v36  ;;  %v1333_v34 = vmul.f32 0.0, %v918_v22  ;;  %v612_v46 = vsub.f32 2.0, %v596_v28 }
 0x243   :  { %v393_v24 = vpop.xlane.xlu1 %392  ;;  %v920_v42 = vpop.eup %919  ;;  %937 = vrcp.f32 %v1321_v37  ;;  %v611_v40 = vsub.f32 2.0, %v595_v44 }
 0x244   :  { %v1326_v33 = vadd.f32 %v393_v24, %v1317_v18  ;;  %v922_v43 = vpop.eup %921  ;;  %v395_v45 = vpop.xlane.xlu0 %394  ;;  %v598_v50 = vmul.f32 %v920_v42, %v405_v3  ;;  %v628_v6 = vmul.f32 %v914_v21, %v612_v46 }
 0x245   :  { %v924_v48 = vpop.eup %923  ;;  %v1343_v58 = vadd.f32 %v395_v45, %v1336_v52  ;;  %v1347_v61 = vmul.f32 0.0, %v922_v43  ;;  %v627_v13 = vmul.f32 %v916_v27, %v611_v40 }
 0x246   :  { %v926_v49 = vpop.eup %925  ;;  %939 = vrcp.f32 %v1326_v33  ;;  %v597_v53 = vmul.f32 %v924_v48, %v404_v7  ;;  %v614_v63 = vsub.f32 2.0, %v598_v50 }
 0x247   :  { %v397_v41 = vpop.xlane.xlu1 %396  ;;  %v928_v51 = vpop.eup %927  ;;  %941 = vrcp.f32 %v1330_v39  ;;  %v1345_v59 = vmul.f32 0.0, %v926_v49 }
 0x248   :  { %v1339_v55 = vadd.f32 %v397_v41, %v1333_v34  ;;  %v930_v54 = vpop.eup %929  ;;  %v600_v0 = vmul.f32 %v928_v51, %v407_v5  ;;  %v399_v1 = vpop.xlane.xlu0 %398  ;;  %v613_v9 = vsub.f32 2.0, %v597_v53  ;;  %v630_v30 = vmul.f32 %v920_v42, %v614_v63 }
 0x249   :  { %v599_v10 = vmul.f32 %v930_v54, %v1296_v14  ;;  %v1357_v5 = vadd.f32 %v399_v1, %v1347_v61 }
 0x24a   :  { %943 = vrcp.f32 %v1339_v55  ;;  %v616_v24 = vsub.f32 2.0, %v600_v0  ;;  %v629_v22 = vmul.f32 %v924_v48, %v613_v9 }
 0x24b   :  { %v401_v47 = vpop.xlane.xlu1 %400  ;;  %v932_v7 = vpop.eup %931  ;;  %945 = vrcp.f32 %v1343_v58  ;;  %v615_v21 = vsub.f32 2.0, %v599_v10 }
 0x24c   :  { %v1351_v4 = vadd.f32 %v401_v47, %v1345_v59  ;;  %v934_v23 = vpop.eup %933  ;;  %v632_v43 = vmul.f32 %v928_v51, %v616_v24 }
 0x24d   :  { %v631_v50 = vmul.f32 %v930_v54, %v615_v21 }
 0x24e   :  { %947 = vrcp.f32 %v1351_v4 }
 0x24f   :  { %v936_v32 = vpop.eup %935  ;;  %949 = vrcp.f32 %v1357_v5 }
 0x250   :  { %v938_v42 = vpop.eup %937  ;;  %v604_v45 = vmul.f32 %v936_v32, %v1315_v36 }
 0x252   :  { %v620_v63 = vsub.f32 2.0, %v604_v45 }
 0x253   :  { %v940_v44 = vpop.eup %939 }
 0x254   :  { %v942_v46 = vpop.eup %941  ;;  %v606_v53 = vmul.f32 %v940_v44, %v1326_v33 }
 0x255   :  { %v605_v1 = vmul.f32 %v942_v46, %v1330_v39 }
 0x256   :  { %v622_v10 = vsub.f32 2.0, %v606_v53 }
 0x266   :  { %v833_v3 = vpop.f32.mrf.mxu1 }
 0x267   :  { %v564_v62 = vadd.f32 %v833_v3, %v1276_v56  ;;  %v602_v56 = vmul.f32 %v932_v7, %v1303_v20 }
 0x268   :  { %v484_v12 = vpop.f32.mrf.mxu1 }
 0x269   :  { %v644_v15 = vmul.f32 %v628_v6, %v564_v62  ;;  %v563_v17 = vadd.f32 %v484_v12, %v1278_v57  ;;  %v601_v57 = vmul.f32 %v934_v23, %v1307_v26 }
 0x26a   :  { %v836_v25 = vpop.f32.mrf.mxu1 }
 0x26b   :  { %660 = vst [vmem:[%s1437_s3 + $0x8] sm:$0xff] %v644_v15  ;;  %v643_v14 = vmul.f32 %v627_v13, %v563_v17  ;;  %v566_v31 = vadd.f32 %v836_v25, %v1283_v60  ;;  %v618_v60 = vsub.f32 2.0, %v602_v56  ;;  %v617_v40 = vsub.f32 2.0, %v601_v57 }
 0x26c   :  { %v494_v27 = vpop.f32.mrf.mxu1  ;;  %v621_v17 = vsub.f32 2.0, %v605_v1 }
 0x26d   :  { %659 = vst [vmem:[%s1437_s3] sm:$0xff] %v643_v14  ;;  %v646_v20 = vmul.f32 %v630_v30, %v566_v31  ;;  %v565_v41 = vadd.f32 %v494_v27, %v1286_v2  ;;  %v603_v2 = vmul.f32 %v938_v42, %v1321_v37  ;;  %v634_v0 = vmul.f32 %v932_v7, %v618_v60  ;;  %v944_v37 = vpop.eup %943 }
 0x26e   :  { %v839_v28 = vpop.f32.mrf.mxu1  ;;  %v633_v6 = vmul.f32 %v934_v23, %v617_v40  ;;  %v946_v9 = vpop.eup %945  ;;  %v608_v13 = vmul.f32 %v944_v37, %v1339_v55  ;;  %v636_v7 = vmul.f32 %v936_v32, %v620_v63  ;;  %v638_v14 = vmul.f32 %v940_v44, %v622_v10 }
 0x26f   :  { %662 = vst [vmem:[%s1437_s3 + $0x18] sm:$0xff] %v646_v20  ;;  %v645_v26 = vmul.f32 %v629_v22, %v565_v41  ;;  %v568_v48 = vadd.f32 %v839_v28, %v1290_v8  ;;  %v619_v62 = vsub.f32 2.0, %v603_v2  ;;  %v948_v15 = vpop.eup %947  ;;  %v607_v25 = vmul.f32 %v946_v9, %v1343_v58 }
 0x270   :  { %v504_v49 = vpop.f32.mrf.mxu1  ;;  %v950_v30 = vpop.eup %949  ;;  %v624_v31 = vsub.f32 2.0, %v608_v13  ;;  %v637_v27 = vmul.f32 %v942_v46, %v621_v17 }
 0x271   :  { %661 = vst [vmem:[%s1437_s3 + $0x10] sm:$0xff] %v645_v26  ;;  %v648_v51 = vmul.f32 %v632_v43, %v568_v48  ;;  %v567_v36 = vadd.f32 %v504_v49, %v1292_v11  ;;  %v635_v23 = vmul.f32 %v938_v42, %v619_v62  ;;  %v623_v22 = vsub.f32 2.0, %v607_v25 }
 0x272   :  { %v842_v47 = vpop.f32.mrf.mxu1  ;;  %v609_v57 = vmul.f32 %v950_v30, %v1357_v5  ;;  %v640_v28 = vmul.f32 %v944_v37, %v624_v31 }
 0x273   :  { %664 = vst [vmem:[%s1437_s3 + $0x28] sm:$0xff] %v648_v51  ;;  %v647_v8 = vmul.f32 %v631_v50, %v567_v36  ;;  %v570_v54 = vadd.f32 %v842_v47, %v1298_v16 }
 0x274   :  { %v514_v3 = vpop.f32.mrf.mxu1  ;;  %v625_v44 = vsub.f32 2.0, %v609_v57 }
 0x275   :  { %663 = vst [vmem:[%s1437_s3 + $0x20] sm:$0xff] %v647_v8  ;;  %v650_v11 = vmul.f32 %v634_v0, %v570_v54  ;;  %v569_v33 = vadd.f32 %v514_v3, %v1300_v19 }
 0x276   :  { %v845_v12 = vpop.f32.mrf.mxu1  ;;  %v641_v40 = vmul.f32 %v950_v30, %v625_v44 }
 0x277   :  { %666 = vst [vmem:[%s1437_s3 + $0x38] sm:$0xff] %v650_v11  ;;  %v649_v16 = vmul.f32 %v633_v6, %v569_v33  ;;  %v572_v39 = vadd.f32 %v845_v12, %v1309_v29  ;;  %v610_v29 = vmul.f32 %v948_v15, %v1351_v4 }
 0x278   :  { %v524_v24 = vpop.f32.mrf.mxu1 }
 0x279   :  { %665 = vst [vmem:[%s1437_s3 + $0x30] sm:$0xff] %v649_v16  ;;  %v652_v19 = vmul.f32 %v636_v7, %v572_v39  ;;  %v571_v55 = vadd.f32 %v524_v24, %v1312_v35  ;;  %v626_v41 = vsub.f32 2.0, %v610_v29 }
 0x27a   :  { %v848_v56 = vpop.f32.mrf.mxu1 }
 0x27b   :  { %668 = vst [vmem:[%s1437_s3 + $0x48] sm:$0xff] %v652_v19  ;;  %v651_v32 = vmul.f32 %v635_v23, %v571_v55  ;;  %v574_v58 = vadd.f32 %v848_v56, %v1317_v18 }
 0x27c   :  { %v534_v21 = vpop.f32.mrf.mxu1 }
 0x27d   :  { %667 = vst [vmem:[%s1437_s3 + $0x40] sm:$0xff] %v651_v32  ;;  %v654_v35 = vmul.f32 %v638_v14, %v574_v58  ;;  %v573_v20 = vadd.f32 %v534_v21, %v1323_v38  ;;  %v639_v38 = vmul.f32 %v946_v9, %v623_v22 }
 0x27e   :  { %v851_v4 = vpop.f32.mrf.mxu1 }
 0x27f   :  { %670 = vst [vmem:[%s1437_s3 + $0x58] sm:$0xff] %v654_v35  ;;  %v653_v42 = vmul.f32 %v637_v27, %v573_v20  ;;  %v576_v18 = vadd.f32 %v851_v4, %v1333_v34  ;;  %v642_v34 = vmul.f32 %v948_v15, %v626_v41 }
 0x280   :  { %v544_v43 = vpop.f32.mrf.mxu1 }
 0x281   :  { %669 = vst [vmem:[%s1437_s3 + $0x50] sm:$0xff] %v653_v42  ;;  %v656_v5 = vmul.f32 %v640_v28, %v576_v18  ;;  %v575_v60 = vadd.f32 %v544_v43, %v1336_v52 }
 0x282   :  { %v854_v45 = vpop.f32.mrf.mxu1 }
 0x283   :  { %672 = vst [vmem:[%s1437_s3 + $0x68] sm:$0xff] %v656_v5  ;;  %v655_v26 = vmul.f32 %v639_v38, %v575_v60  ;;  %v578_v48 = vadd.f32 %v854_v45, %v1345_v59 }
 0x284   :  { %v554_v49 = vpop.f32.mrf.mxu1 }
 0x285   :  { %671 = vst [vmem:[%s1437_s3 + $0x60] sm:$0xff] %v655_v26  ;;  %v658_v50 = vmul.f32 %v642_v34, %v578_v48  ;;  %v577_v46 = vadd.f32 %v554_v49, %v1347_v61 }
 0x287   :  { %674 = vst [vmem:[%s1437_s3 + $0x78] sm:$0xff] %v658_v50  ;;  %v657_v52 = vmul.f32 %v641_v40, %v577_v46 }
 0x289   :  { %673 = vst [vmem:[%s1437_s3 + $0x70] sm:$0xff] %v657_v52 }

// kernel: self_attention_v2.2
= control target key start
LH: loop header
LB: loop body
LE: loop exit
PB: predicated region body
PF: predicated region fallthrough
CT: control target
= control target key end

     0   :  { %s1312_s1 = inlined_call_operand.vmem [shape: f32[128,128], index: 1, kind: input, shape index: {}]   ;;  %s1313_s2 = inlined_call_operand.vmem [shape: f32[128,128], index: 2, kind: input, shape index: {}]   ;;  %s1314_s0 = inlined_call_operand.vmem [shape: f32[128,128], index: 0, kind: input, shape index: {}]   ;;  %s1315_s3 = inlined_call_operand.vmem [shape: f32[128,128], index: 3, kind: input, shape index: {}]   ;;  %s1316_s5 = inlined_call_operand.vmem [shape: f32[128,128], index: 5, kind: output, shape index: {1}]   ;;  %s1317_s4 = inlined_call_operand.vmem [shape: f32[128,128], index: 4, kind: output, shape index: {0}]   ;;  %s1318_s6 = inlined_call_operand.vmem [shape: f32[128,128], index: 6, kind: output, shape index: {2}]  }
   0x1   :  { %v51_v0 = vld [vmem:[%s1312_s1 + $0x78] sm:$0xff]  ;;  %v50_v2 = vld [vmem:[%s1312_s1 + $0x70] sm:$0xff]  ;;  %v49_v4 = vld [vmem:[%s1312_s1 + $0x68] sm:$0xff] }
   0x2   :  { %v244_v1 = vld [vmem:[%s1313_s2 + $0x78] sm:$0xff]  ;;  %691 = vmatprep.subr.mxu0 %v51_v0  ;;  %v243_v3 = vld [vmem:[%s1313_s2 + $0x70] sm:$0xff]  ;;  %v242_v5 = vld [vmem:[%s1313_s2 + $0x68] sm:$0xff] }
   0x3   :  { %747 = vmatprep.subr.mxu1 %v244_v1  ;;  %692 = vmatpush3.msra.mxu0 %v51_v0  ;;  %v48_v6 = vld [vmem:[%s1312_s1 + $0x60] sm:$0xff]  ;;  %v47_v8 = vld [vmem:[%s1312_s1 + $0x58] sm:$0xff]  ;;  %v46_v10 = vld [vmem:[%s1312_s1 + $0x50] sm:$0xff] }
   0x4   :  { %748 = vmatpush3.msra.mxu1 %v244_v1  ;;  %693 = vmatprep.subr.mxu0 %v50_v2  ;;  %v241_v7 = vld [vmem:[%s1313_s2 + $0x60] sm:$0xff]  ;;  %v240_v9 = vld [vmem:[%s1313_s2 + $0x58] sm:$0xff]  ;;  %v239_v11 = vld [vmem:[%s1313_s2 + $0x50] sm:$0xff] }
   0x5   :  { %749 = vmatprep.subr.mxu1 %v243_v3  ;;  %694 = vmatpush3.msra.mxu0 %v50_v2  ;;  %v45_v12 = vld [vmem:[%s1312_s1 + $0x48] sm:$0xff]  ;;  %v44_v14 = vld [vmem:[%s1312_s1 + $0x40] sm:$0xff]  ;;  %v43_v16 = vld [vmem:[%s1312_s1 + $0x38] sm:$0xff] }
   0x6   :  { %750 = vmatpush3.msra.mxu1 %v243_v3  ;;  %695 = vmatprep.subr.mxu0 %v49_v4  ;;  %v238_v13 = vld [vmem:[%s1313_s2 + $0x48] sm:$0xff]  ;;  %v237_v15 = vld [vmem:[%s1313_s2 + $0x40] sm:$0xff]  ;;  %v236_v17 = vld [vmem:[%s1313_s2 + $0x38] sm:$0xff] }
   0x7   :  { %751 = vmatprep.subr.mxu1 %v242_v5  ;;  %696 = vmatpush3.msra.mxu0 %v49_v4  ;;  %v42_v18 = vld [vmem:[%s1312_s1 + $0x30] sm:$0xff]  ;;  %v41_v20 = vld [vmem:[%s1312_s1 + $0x28] sm:$0xff]  ;;  %v40_v22 = vld [vmem:[%s1312_s1 + $0x20] sm:$0xff] }
   0x8   :  { %752 = vmatpush3.msra.mxu1 %v242_v5  ;;  %697 = vmatprep.subr.mxu0 %v48_v6  ;;  %v235_v19 = vld [vmem:[%s1313_s2 + $0x30] sm:$0xff]  ;;  %v234_v21 = vld [vmem:[%s1313_s2 + $0x28] sm:$0xff]  ;;  %v233_v23 = vld [vmem:[%s1313_s2 + $0x20] sm:$0xff] }
   0x9   :  { %753 = vmatprep.subr.mxu1 %v241_v7  ;;  %698 = vmatpush3.msra.mxu0 %v48_v6  ;;  %v39_v24 = vld [vmem:[%s1312_s1 + $0x18] sm:$0xff]  ;;  %v38_v26 = vld [vmem:[%s1312_s1 + $0x10] sm:$0xff]  ;;  %v37_v28 = vld [vmem:[%s1312_s1 + $0x8] sm:$0xff] }
   0xa   :  { %754 = vmatpush3.msra.mxu1 %v241_v7  ;;  %699 = vmatprep.subr.mxu0 %v47_v8  ;;  %v232_v25 = vld [vmem:[%s1313_s2 + $0x18] sm:$0xff]  ;;  %v231_v27 = vld [vmem:[%s1313_s2 + $0x10] sm:$0xff]  ;;  %v230_v29 = vld [vmem:[%s1313_s2 + $0x8] sm:$0xff] }
   0xb   :  { %755 = vmatprep.subr.mxu1 %v240_v9  ;;  %700 = vmatpush3.msra.mxu0 %v47_v8  ;;  %v36_v30 = vld [vmem:[%s1312_s1] sm:$0xff]  ;;  %v1030_v33 = vld [vmem:[%s1314_s0 + $0x8] sm:$0xff]  ;;  %v421_v34 = vld [vmem:[%s1315_s3 + $0x78] sm:$0xff] }
   0xc   :  { %756 = vmatpush3.msra.mxu1 %v240_v9  ;;  %701 = vmatprep.subr.mxu0 %v46_v10  ;;  %v229_v31 = vld [vmem:[%s1313_s2] sm:$0xff]  ;;  %v420_v35 = vld [vmem:[%s1315_s3 + $0x70] sm:$0xff]  ;;  %v1050_v37 = vld [vmem:[%s1314_s0 + $0x18] sm:$0xff] }
   0xd   :  { %757 = vmatprep.subr.mxu1 %v239_v11  ;;  %702 = vmatpush3.msra.mxu0 %v46_v10  ;;  %v1025_v32 = vld [vmem:[%s1314_s0] sm:$0xff]  ;;  %v1045_v36 = vld [vmem:[%s1314_s0 + $0x10] sm:$0xff]  ;;  %v419_v38 = vld [vmem:[%s1315_s3 + $0x68] sm:$0xff] }
   0xe   :  { %758 = vmatpush3.msra.mxu1 %v239_v11  ;;  %703 = vmatprep.subr.mxu0 %v45_v12  ;;  %v418_v39 = vld [vmem:[%s1315_s3 + $0x60] sm:$0xff]  ;;  %v1070_v41 = vld [vmem:[%s1314_s0 + $0x28] sm:$0xff]  ;;  %v417_v42 = vld [vmem:[%s1315_s3 + $0x58] sm:$0xff] }
   0xf   :  { %759 = vmatprep.subr.mxu1 %v238_v13  ;;  %704 = vmatpush3.msra.mxu0 %v45_v12  ;;  %v1065_v40 = vld [vmem:[%s1314_s0 + $0x20] sm:$0xff]  ;;  %v416_v43 = vld [vmem:[%s1315_s3 + $0x50] sm:$0xff]  ;;  %v1090_v45 = vld [vmem:[%s1314_s0 + $0x38] sm:$0xff] }
  0x10   :  { %760 = vmatpush3.msra.mxu1 %v238_v13  ;;  %705 = vmatprep.subr.mxu0 %v44_v14  ;;  %v1085_v44 = vld [vmem:[%s1314_s0 + $0x30] sm:$0xff]  ;;  %v415_v46 = vld [vmem:[%s1315_s3 + $0x48] sm:$0xff]  ;;  %v414_v47 = vld [vmem:[%s1315_s3 + $0x40] sm:$0xff] }
  0x11   :  { %761 = vmatprep.subr.mxu1 %v237_v15  ;;  %706 = vmatpush3.msra.mxu0 %v44_v14  ;;  %v1105_v48 = vld [vmem:[%s1314_s0 + $0x40] sm:$0xff]  ;;  %v1110_v49 = vld [vmem:[%s1314_s0 + $0x48] sm:$0xff]  ;;  %v413_v50 = vld [vmem:[%s1315_s3 + $0x38] sm:$0xff] }
  0x12   :  { %762 = vmatpush3.msra.mxu1 %v237_v15  ;;  %707 = vmatprep.subr.mxu0 %v43_v16  ;;  %v412_v51 = vld [vmem:[%s1315_s3 + $0x30] sm:$0xff]  ;;  %v31_v53 = vld [vmem:[%s1314_s0 + $0x58] sm:$0xff]  ;;  %v411_v54 = vld [vmem:[%s1315_s3 + $0x28] sm:$0xff] }
  0x13   :  { %763 = vmatprep.subr.mxu1 %v236_v17  ;;  %708 = vmatpush3.msra.mxu0 %v43_v16  ;;  %v30_v52 = vld [vmem:[%s1314_s0 + $0x50] sm:$0xff]  ;;  %v410_v55 = vld [vmem:[%s1315_s3 + $0x20] sm:$0xff]  ;;  %v33_v57 = vld [vmem:[%s1314_s0 + $0x68] sm:$0xff] }
  0x14   :  { %764 = vmatpush3.msra.mxu1 %v236_v17  ;;  %709 = vmatprep.subr.mxu0 %v42_v18  ;;  %v32_v56 = vld [vmem:[%s1314_s0 + $0x60] sm:$0xff]  ;;  %v409_v58 = vld [vmem:[%s1315_s3 + $0x18] sm:$0xff]  ;;  %v408_v59 = vld [vmem:[%s1315_s3 + $0x10] sm:$0xff] }
  0x15   :  { %765 = vmatprep.subr.mxu1 %v235_v19  ;;  %710 = vmatpush3.msra.mxu0 %v42_v18  ;;  %v34_v60 = vld [vmem:[%s1314_s0 + $0x70] sm:$0xff]  ;;  %v35_v61 = vld [vmem:[%s1314_s0 + $0x78] sm:$0xff]  ;;  %v407_v62 = vld [vmem:[%s1315_s3 + $0x8] sm:$0xff] }
  0x16   :  { %766 = vmatpush3.msra.mxu1 %v235_v19  ;;  %711 = vmatprep.subr.mxu0 %v41_v20  ;;  %v406_v63 = vld [vmem:[%s1315_s3] sm:$0xff] }
  0x17   :  { %767 = vmatprep.subr.mxu1 %v234_v21  ;;  %712 = vmatpush3.msra.mxu0 %v41_v20 }
  0x18   :  { %768 = vmatpush3.msra.mxu1 %v234_v21  ;;  %713 = vmatprep.subr.mxu0 %v40_v22 }
  0x19   :  { %769 = vmatprep.subr.mxu1 %v233_v23  ;;  %714 = vmatpush3.msra.mxu0 %v40_v22 }
  0x1a   :  { %770 = vmatpush3.msra.mxu1 %v233_v23  ;;  %715 = vmatprep.subr.mxu0 %v39_v24 }
  0x1b   :  { %771 = vmatprep.subr.mxu1 %v232_v25  ;;  %716 = vmatpush3.msra.mxu0 %v39_v24 }
  0x1c   :  { %772 = vmatpush3.msra.mxu1 %v232_v25  ;;  %717 = vmatprep.subr.mxu0 %v38_v26 }
  0x1d   :  { %773 = vmatprep.subr.mxu1 %v231_v27  ;;  %718 = vmatpush3.msra.mxu0 %v38_v26 }
  0x1e   :  { %774 = vmatpush3.msra.mxu1 %v231_v27  ;;  %719 = vmatprep.subr.mxu0 %v37_v28 }
  0x1f   :  { %775 = vmatprep.subr.mxu1 %v230_v29  ;;  %720 = vmatpush3.msra.mxu0 %v37_v28 }
  0x20   :  { %776 = vmatpush3.msra.mxu1 %v230_v29  ;;  %721 = vmatprep.subr.mxu0 %v36_v30 }
  0x21   :  { %777 = vmatprep.subr.mxu1 %v229_v31  ;;  %722 = vmatpush3.msra.mxu0 %v36_v30 }
  0x22   :  { %723 = vmatprep.mubr.f32.mxu0 %v1025_v32  ;;  %778 = vmatpush3.msra.mxu1 %v229_v31 }
  0x23   :  { %779 = vmatprep.mubr.f32.mxu1 %v1025_v32  ;;  %724 = vmatmul.mubr.f32.vlgmr.msra.gmra.mxu0 %v1030_v33 }
  0x24   :  { %780 = vmatmul.mubr.f32.vlgmr.msra.gmra.mxu1 %v1030_v33  ;;  %803 = vmatprep.subr.mxu0 %v421_v34 }
  0x25   :  { %859 = vmatprep.subr.mxu1 %v421_v34  ;;  %804 = vmatpush3.msra.mxu0 %v421_v34 }
  0x26   :  { %875 = vmatpush3.msra.mxu1 %v421_v34  ;;  %805 = vmatprep.subr.mxu0 %v420_v35 }
  0x27   :  { %860 = vmatprep.subr.mxu1 %v420_v35  ;;  %726 = vmatprep.mubr.f32.mxu0 %v1045_v36 }
  0x28   :  { %782 = vmatprep.mubr.f32.mxu1 %v1045_v36  ;;  %806 = vmatpush3.msra.mxu0 %v420_v35 }
  0x29   :  { %876 = vmatpush3.msra.mxu1 %v420_v35  ;;  %727 = vmatmul.mubr.f32.gmra.mxu0 %v1050_v37 }
  0x2a   :  { %783 = vmatmul.mubr.f32.gmra.mxu1 %v1050_v37  ;;  %807 = vmatprep.subr.mxu0 %v419_v38 }
  0x2b   :  { %861 = vmatprep.subr.mxu1 %v419_v38  ;;  %808 = vmatpush3.msra.mxu0 %v419_v38 }
  0x2c   :  { %877 = vmatpush3.msra.mxu1 %v419_v38  ;;  %809 = vmatprep.subr.mxu0 %v418_v39 }
  0x2d   :  { %862 = vmatprep.subr.mxu1 %v418_v39  ;;  %729 = vmatprep.mubr.f32.mxu0 %v1065_v40 }
  0x2e   :  { %785 = vmatprep.mubr.f32.mxu1 %v1065_v40  ;;  %810 = vmatpush3.msra.mxu0 %v418_v39 }
  0x2f   :  { %878 = vmatpush3.msra.mxu1 %v418_v39  ;;  %730 = vmatmul.mubr.f32.gmra.mxu0 %v1070_v41 }
  0x30   :  { %786 = vmatmul.mubr.f32.gmra.mxu1 %v1070_v41  ;;  %811 = vmatprep.subr.mxu0 %v417_v42 }
  0x31   :  { %863 = vmatprep.subr.mxu1 %v417_v42  ;;  %812 = vmatpush3.msra.mxu0 %v417_v42 }
  0x32   :  { %879 = vmatpush3.msra.mxu1 %v417_v42  ;;  %813 = vmatprep.subr.mxu0 %v416_v43 }
  0x33   :  { %864 = vmatprep.subr.mxu1 %v416_v43  ;;  %732 = vmatprep.mubr.f32.mxu0 %v1085_v44 }
  0x34   :  { %788 = vmatprep.mubr.f32.mxu1 %v1085_v44  ;;  %814 = vmatpush3.msra.mxu0 %v416_v43 }
  0x35   :  { %880 = vmatpush3.msra.mxu1 %v416_v43  ;;  %733 = vmatmul.mubr.f32.gmra.mxu0 %v1090_v45 }
  0x36   :  { %789 = vmatmul.mubr.f32.gmra.mxu1 %v1090_v45  ;;  %815 = vmatprep.subr.mxu0 %v415_v46 }
  0x37   :  { %865 = vmatprep.subr.mxu1 %v415_v46  ;;  %816 = vmatpush3.msra.mxu0 %v415_v46 }
  0x38   :  { %881 = vmatpush3.msra.mxu1 %v415_v46  ;;  %817 = vmatprep.subr.mxu0 %v414_v47 }
  0x39   :  { %866 = vmatprep.subr.mxu1 %v414_v47  ;;  %735 = vmatprep.mubr.f32.mxu0 %v1105_v48 }
  0x3a   :  { %791 = vmatprep.mubr.f32.mxu1 %v1105_v48  ;;  %818 = vmatpush3.msra.mxu0 %v414_v47 }
  0x3b   :  { %882 = vmatpush3.msra.mxu1 %v414_v47  ;;  %736 = vmatmul.mubr.f32.gmra.mxu0 %v1110_v49 }
  0x3c   :  { %792 = vmatmul.mubr.f32.gmra.mxu1 %v1110_v49  ;;  %819 = vmatprep.subr.mxu0 %v413_v50 }
  0x3d   :  { %867 = vmatprep.subr.mxu1 %v413_v50  ;;  %820 = vmatpush3.msra.mxu0 %v413_v50 }
  0x3e   :  { %883 = vmatpush3.msra.mxu1 %v413_v50  ;;  %821 = vmatprep.subr.mxu0 %v412_v51 }
  0x3f   :  { %868 = vmatprep.subr.mxu1 %v412_v51  ;;  %738 = vmatprep.mubr.f32.mxu0 %v30_v52 }
  0x40   :  { %794 = vmatprep.mubr.f32.mxu1 %v30_v52  ;;  %822 = vmatpush3.msra.mxu0 %v412_v51 }
  0x41   :  { %884 = vmatpush3.msra.mxu1 %v412_v51  ;;  %739 = vmatmul.mubr.f32.gmra.mxu0 %v31_v53 }
  0x42   :  { %795 = vmatmul.mubr.f32.gmra.mxu1 %v31_v53  ;;  %823 = vmatprep.subr.mxu0 %v411_v54 }
  0x43   :  { %869 = vmatprep.subr.mxu1 %v411_v54  ;;  %824 = vmatpush3.msra.mxu0 %v411_v54 }
  0x44   :  { %885 = vmatpush3.msra.mxu1 %v411_v54  ;;  %825 = vmatprep.subr.mxu0 %v410_v55 }
  0x45   :  { %870 = vmatprep.subr.mxu1 %v410_v55  ;;  %741 = vmatprep.mubr.f32.mxu0 %v32_v56 }
  0x46   :  { %797 = vmatprep.mubr.f32.mxu1 %v32_v56  ;;  %826 = vmatpush3.msra.mxu0 %v410_v55 }
  0x47   :  { %886 = vmatpush3.msra.mxu1 %v410_v55  ;;  %742 = vmatmul.mubr.f32.gmra.mxu0 %v33_v57 }
  0x48   :  { %798 = vmatmul.mubr.f32.gmra.mxu1 %v33_v57  ;;  %827 = vmatprep.subr.mxu0 %v409_v58 }
  0x49   :  { %871 = vmatprep.subr.mxu1 %v409_v58  ;;  %828 = vmatpush3.msra.mxu0 %v409_v58 }
  0x4a   :  { %887 = vmatpush3.msra.mxu1 %v409_v58  ;;  %829 = vmatprep.subr.mxu0 %v408_v59 }
  0x4b   :  { %872 = vmatprep.subr.mxu1 %v408_v59  ;;  %744 = vmatprep.mubr.f32.mxu0 %v34_v60 }
  0x4c   :  { %800 = vmatprep.mubr.f32.mxu1 %v34_v60  ;;  %830 = vmatpush3.msra.mxu0 %v408_v59 }
  0x4d   :  { %888 = vmatpush3.msra.mxu1 %v408_v59  ;;  %745 = vmatmul.mubr.f32.gmra.mxu0 %v35_v61 }
  0x4e   :  { %801 = vmatmul.mubr.f32.gmra.mxu1 %v35_v61  ;;  %831 = vmatprep.subr.mxu0 %v407_v62 }
  0x4f   :  { %873 = vmatprep.subr.mxu1 %v407_v62  ;;  %832 = vmatpush3.msra.mxu0 %v407_v62 }
  0x50   :  { %889 = vmatpush3.msra.mxu1 %v407_v62  ;;  %833 = vmatprep.subr.mxu0 %v406_v63 }
  0x51   :  { %874 = vmatprep.subr.mxu1 %v406_v63  ;;  %834 = vmatpush3.msra.mxu0 %v406_v63 }
  0x52   :  { %890 = vmatpush3.msra.mxu1 %v406_v63  ;;  %835 = vmatprep.mubr.f32.mxu0 %v1025_v32 }
  0x53   :  { %847 = vmatprep.mubr.f32.mxu1 %v1105_v48  ;;  %836 = vmatmul.mubr.f32.vlgmr.msra.gmra.mxu0 %v1030_v33 }
  0x54   :  { %848 = vmatmul.mubr.f32.vlgmr.msra.gmra.mxu1 %v1110_v49  ;;  %838 = vmatprep.mubr.f32.mxu0 %v1045_v36 }
  0x55   :  { %850 = vmatprep.mubr.f32.mxu1 %v30_v52 }
  0x57   :  { %839 = vmatmul.mubr.f32.gmra.mxu0 %v1050_v37 }
  0x58   :  { %851 = vmatmul.mubr.f32.gmra.mxu1 %v31_v53  ;;  %841 = vmatprep.mubr.f32.mxu0 %v1065_v40 }
  0x59   :  { %853 = vmatprep.mubr.f32.mxu1 %v32_v56 }
  0x5b   :  { %842 = vmatmul.mubr.f32.gmra.mxu0 %v1070_v41 }
  0x5c   :  { %854 = vmatmul.mubr.f32.gmra.mxu1 %v33_v57  ;;  %844 = vmatprep.mubr.f32.mxu0 %v1085_v44 }
  0x5d   :  { %856 = vmatprep.mubr.f32.mxu1 %v34_v60 }
  0x5f   :  { %845 = vmatmul.mubr.f32.gmra.mxu0 %v1090_v45 }
  0x60   :  { %857 = vmatmul.mubr.f32.gmra.mxu1 %v35_v61 }
  0xe3   :  { %v725_v0 = vpop.f32.mrf.mxu0 }
  0xe4   :  { %v781_v1 = vpop.f32.mrf.mxu1  ;;  %v198_v2 = vmul.f32 0.70710677, %v725_v0 }
  0xe5   :  { %391 = vst [vmem:[%s1316_s5 + $0x8] sm:$0xff] %v781_v1  ;;  %v118_v3 = vpop.f32.mrf.mxu0 }
  0xe6   :  { %v311_v4 = vpop.f32.mrf.mxu1  ;;  %214 = vst [vmem:[%s1317_s4 + $0x8] sm:$0xff] %v198_v2  ;;  %v197_v5 = vmul.f32 0.70710677, %v118_v3 }
  0xe7   :  { %390 = vst [vmem:[%s1316_s5] sm:$0xff] %v311_v4 }
  0xe8   :  { %213 = vst [vmem:[%s1317_s4] sm:$0xff] %v197_v5 }
  0xe9   :  { %v728_v6 = vpop.f32.mrf.mxu0 }
  0xea   :  { %v784_v7 = vpop.f32.mrf.mxu1  ;;  %v200_v8 = vmul.f32 0.70710677, %v728_v6 }
  0xeb   :  { %393 = vst [vmem:[%s1316_s5 + $0x18] sm:$0xff] %v784_v7  ;;  %v128_v9 = vpop.f32.mrf.mxu0 }
  0xec   :  { %v321_v10 = vpop.f32.mrf.mxu1  ;;  %216 = vst [vmem:[%s1317_s4 + $0x18] sm:$0xff] %v200_v8  ;;  %v199_v11 = vmul.f32 0.70710677, %v128_v9 }
  0xed   :  { %392 = vst [vmem:[%s1316_s5 + $0x10] sm:$0xff] %v321_v10 }
  0xee   :  { %215 = vst [vmem:[%s1317_s4 + $0x10] sm:$0xff] %v199_v11 }
  0xef   :  { %v731_v12 = vpop.f32.mrf.mxu0 }
  0xf0   :  { %v787_v13 = vpop.f32.mrf.mxu1  ;;  %v202_v14 = vmul.f32 0.70710677, %v731_v12 }
  0xf1   :  { %395 = vst [vmem:[%s1316_s5 + $0x28] sm:$0xff] %v787_v13  ;;  %v138_v15 = vpop.f32.mrf.mxu0 }
  0xf2   :  { %v331_v16 = vpop.f32.mrf.mxu1  ;;  %218 = vst [vmem:[%s1317_s4 + $0x28] sm:$0xff] %v202_v14  ;;  %v201_v17 = vmul.f32 0.70710677, %v138_v15 }
  0xf3   :  { %394 = vst [vmem:[%s1316_s5 + $0x20] sm:$0xff] %v331_v16 }
  0xf4   :  { %217 = vst [vmem:[%s1317_s4 + $0x20] sm:$0xff] %v201_v17 }
  0xf5   :  { %v734_v18 = vpop.f32.mrf.mxu0 }
  0xf6   :  { %v790_v19 = vpop.f32.mrf.mxu1  ;;  %v204_v20 = vmul.f32 0.70710677, %v734_v18 }
  0xf7   :  { %397 = vst [vmem:[%s1316_s5 + $0x38] sm:$0xff] %v790_v19  ;;  %v148_v21 = vpop.f32.mrf.mxu0 }
  0xf8   :  { %v341_v22 = vpop.f32.mrf.mxu1  ;;  %220 = vst [vmem:[%s1317_s4 + $0x38] sm:$0xff] %v204_v20  ;;  %v203_v23 = vmul.f32 0.70710677, %v148_v21 }
  0xf9   :  { %396 = vst [vmem:[%s1316_s5 + $0x30] sm:$0xff] %v341_v22 }
  0xfa   :  { %219 = vst [vmem:[%s1317_s4 + $0x30] sm:$0xff] %v203_v23 }
  0xfb   :  { %v737_v24 = vpop.f32.mrf.mxu0 }
  0xfc   :  { %v793_v25 = vpop.f32.mrf.mxu1  ;;  %v206_v26 = vmul.f32 0.70710677, %v737_v24 }
  0xfd   :  { %399 = vst [vmem:[%s1316_s5 + $0x48] sm:$0xff] %v793_v25  ;;  %v158_v27 = vpop.f32.mrf.mxu0 }
  0xfe   :  { %v351_v28 = vpop.f32.mrf.mxu1  ;;  %222 = vst [vmem:[%s1317_s4 + $0x48] sm:$0xff] %v206_v26  ;;  %v205_v29 = vmul.f32 0.70710677, %v158_v27 }
  0xff   :  { %398 = vst [vmem:[%s1316_s5 + $0x40] sm:$0xff] %v351_v28 }
 0x100   :  { %221 = vst [vmem:[%s1317_s4 + $0x40] sm:$0xff] %v205_v29 }
 0x101   :  { %v740_v30 = vpop.f32.mrf.mxu0 }
 0x102   :  { %v796_v31 = vpop.f32.mrf.mxu1  ;;  %v208_v32 = vmul.f32 0.70710677, %v740_v30 }
 0x103   :  { %401 = vst [vmem:[%s1316_s5 + $0x58] sm:$0xff] %v796_v31  ;;  %v168_v33 = vpop.f32.mrf.mxu0 }
 0x104   :  { %v361_v34 = vpop.f32.mrf.mxu1  ;;  %224 = vst [vmem:[%s1317_s4 + $0x58] sm:$0xff] %v208_v32  ;;  %v207_v35 = vmul.f32 0.70710677, %v168_v33 }
 0x105   :  { %400 = vst [vmem:[%s1316_s5 + $0x50] sm:$0xff] %v361_v34 }
 0x106   :  { %223 = vst [vmem:[%s1317_s4 + $0x50] sm:$0xff] %v207_v35 }
 0x107   :  { %v743_v36 = vpop.f32.mrf.mxu0 }
 0x108   :  { %v799_v37 = vpop.f32.mrf.mxu1  ;;  %v210_v38 = vmul.f32 0.70710677, %v743_v36 }
 0x109   :  { %403 = vst [vmem:[%s1316_s5 + $0x68] sm:$0xff] %v799_v37  ;;  %v178_v39 = vpop.f32.mrf.mxu0 }
 0x10a   :  { %v371_v40 = vpop.f32.mrf.mxu1  ;;  %226 = vst [vmem:[%s1317_s4 + $0x68] sm:$0xff] %v210_v38  ;;  %v209_v41 = vmul.f32 0.70710677, %v178_v39 }
 0x10b   :  { %402 = vst [vmem:[%s1316_s5 + $0x60] sm:$0xff] %v371_v40 }
 0x10c   :  { %225 = vst [vmem:[%s1317_s4 + $0x60] sm:$0xff] %v209_v41 }
 0x10d   :  { %v746_v42 = vpop.f32.mrf.mxu0 }
 0x10e   :  { %v802_v43 = vpop.f32.mrf.mxu1  ;;  %v212_v44 = vmul.f32 0.70710677, %v746_v42 }
 0x10f   :  { %405 = vst [vmem:[%s1316_s5 + $0x78] sm:$0xff] %v802_v43  ;;  %v188_v45 = vpop.f32.mrf.mxu0 }
 0x110   :  { %v381_v46 = vpop.f32.mrf.mxu1  ;;  %228 = vst [vmem:[%s1317_s4 + $0x78] sm:$0xff] %v212_v44  ;;  %v211_v47 = vmul.f32 0.70710677, %v188_v45 }
 0x111   :  { %404 = vst [vmem:[%s1316_s5 + $0x70] sm:$0xff] %v381_v46 }
 0x112   :  { %227 = vst [vmem:[%s1317_s4 + $0x70] sm:$0xff] %v211_v47 }
 0x113   :  { %v837_v48 = vpop.f32.mrf.mxu0 }
 0x114   :  { %v849_v49 = vpop.f32.mrf.mxu1  ;;  %568 = vst [vmem:[%s1318_s6 + $0x8] sm:$0xff] %v837_v48 }
 0x115   :  { %576 = vst [vmem:[%s1318_s6 + $0x48] sm:$0xff] %v849_v49  ;;  %v488_v50 = vpop.f32.mrf.mxu0 }
 0x116   :  { %v528_v51 = vpop.f32.mrf.mxu1  ;;  %567 = vst [vmem:[%s1318_s6] sm:$0xff] %v488_v50 }
 0x117   :  { %575 = vst [vmem:[%s1318_s6 + $0x40] sm:$0xff] %v528_v51  ;;  %v840_v52 = vpop.f32.mrf.mxu0 }
 0x118   :  { %v852_v53 = vpop.f32.mrf.mxu1  ;;  %570 = vst [vmem:[%s1318_s6 + $0x18] sm:$0xff] %v840_v52 }
 0x119   :  { %578 = vst [vmem:[%s1318_s6 + $0x58] sm:$0xff] %v852_v53  ;;  %v498_v54 = vpop.f32.mrf.mxu0 }
 0x11a   :  { %v538_v55 = vpop.f32.mrf.mxu1  ;;  %569 = vst [vmem:[%s1318_s6 + $0x10] sm:$0xff] %v498_v54 }
 0x11b   :  { %577 = vst [vmem:[%s1318_s6 + $0x50] sm:$0xff] %v538_v55  ;;  %v843_v56 = vpop.f32.mrf.mxu0 }
 0x11c   :  { %v855_v57 = vpop.f32.mrf.mxu1  ;;  %572 = vst [vmem:[%s1318_s6 + $0x28] sm:$0xff] %v843_v56 }
 0x11d   :  { %580 = vst [vmem:[%s1318_s6 + $0x68] sm:$0xff] %v855_v57  ;;  %v508_v58 = vpop.f32.mrf.mxu0 }
 0x11e   :  { %v548_v59 = vpop.f32.mrf.mxu1  ;;  %571 = vst [vmem:[%s1318_s6 + $0x20] sm:$0xff] %v508_v58 }
 0x11f   :  { %579 = vst [vmem:[%s1318_s6 + $0x60] sm:$0xff] %v548_v59  ;;  %v846_v60 = vpop.f32.mrf.mxu0 }
 0x120   :  { %v858_v61 = vpop.f32.mrf.mxu1  ;;  %574 = vst [vmem:[%s1318_s6 + $0x38] sm:$0xff] %v846_v60 }
 0x121   :  { %582 = vst [vmem:[%s1318_s6 + $0x78] sm:$0xff] %v858_v61  ;;  %v518_v62 = vpop.f32.mrf.mxu0 }
 0x122   :  { %v558_v63 = vpop.f32.mrf.mxu1  ;;  %573 = vst [vmem:[%s1318_s6 + $0x30] sm:$0xff] %v518_v62 }
 0x123   :  { %581 = vst [vmem:[%s1318_s6 + $0x70] sm:$0xff] %v558_v63 }

</bundles_post_ra>
